<compile_context>
chip_gen: v6e
topology: v6e:2x2x1
jax: 0.10.0
libtpu: 0.0.40
codegen_flags: <defaults>
</compile_context>

<pallas_src>
import functools

import jax
import jax.numpy as jnp
from jax.experimental import pallas as pl
from jax.experimental.pallas import tpu as pltpu


_F32 = jnp.float32
HP = 128  # lane-dense (padded) hidden width


# ----------------------------------------------------------------------------
# Single fused kernel: grid axis = EGNN layer index (sequential, "arbitrary")
# ----------------------------------------------------------------------------
def _egnn_fused_kernel(
    x_ref,      # (N, IN)      input node features            (constant block)
    efeat_ref,  # (E, HP)      [edge_attr, dist2, 0...]       (constant block)
    gsrc_ref,   # (E, N)       one-hot gather of src nodes    (constant block)
    gdst_ref,   # (E, N)       one-hot gather of dst nodes    (constant block)
    scat_ref,   # (N, E)       one-hot scatter onto dst nodes (constant block)
    pool_ref,   # (G, N)       one-hot global_add_pool        (constant block)
    w0_ref,     # (IN, HP)     first Linear weight            (constant block)
    b0_ref,     # (1, HP)      first Linear bias              (constant block)
    wsq_ref,    # (7, HP, HP)  per-layer: [W_hd,W_hs,W_ed,W_m2,W_uh,W_ua,W_u2]
    bias_ref,   # (8, HP)      per-layer: [b1,b_m2,b_u1,b_u2, pad...]
    hw_ref,     # (4, HP, HP)  head: [p1_w1, p1_w2, p2_w1, p2_w2]
    hv_ref,     # (8, HP)      head: [p1_b1,p1_g,p1_bt,p1_b2,p2_b1,p2_g,p2_bt,p2_b2]
    out_ref,    # (G, HP)      output (only column 0 is the real prediction)
    h_ref,      # (N, HP)      VMEM scratch: resident node features
    *, eps,
):
    f32 = jnp.float32
    l = pl.program_id(0)

    def silu(v):
        return v * jax.nn.sigmoid(v)

    def mm(a, b):
        return jnp.dot(a, b, preferred_element_type=f32)

    # ---- fused first layer: h = SiLU(x @ W0 + b0), runs once, stays in VMEM.
    @pl.when(l == 0)
    def _():
        h_ref[...] = silu(mm(x_ref[...], w0_ref[...]) + b0_ref[...])

    h = h_ref[...]                                   # (N, HP), VMEM-resident

    # ---- phi_e layer 1: node-side projections + one-hot gathers (no concat,
    #      no per-edge projection matmuls, no out-of-kernel h[src]/h[dst]).
    proj_dst = mm(h, wsq_ref[0])                     # h @ W_hd   (N, HP)
    proj_src = mm(h, wsq_ref[1])                     # h @ W_hs   (N, HP)
    m = mm(gdst_ref[...], proj_dst)                  # gather -> (E, HP)
    m = m + mm(gsrc_ref[...], proj_src)
    m = m + mm(efeat_ref[...], wsq_ref[2])           # [edge_attr,dist2] @ [W_e;w_d]
    m = silu(m + bias_ref[0:1, :])

    # ---- phi_e layer 2
    m = silu(mm(m, wsq_ref[3]) + bias_ref[1:2, :])

    # ---- sum-aggregate messages onto dst nodes (exact f32 one-hot matmul)
    agg = mm(scat_ref[...], m)                       # (N, HP)

    # ---- phi_h (split-weight, no concat) + residual update of resident h
    u = silu(mm(h, wsq_ref[4]) + mm(agg, wsq_ref[5]) + bias_ref[2:3, :])
    u = mm(u, wsq_ref[6]) + bias_ref[3:4, :]
    h_ref[...] = h + u

    # ---- fused head on the last layer iteration
    @pl.when(l == pl.num_programs(0) - 1)
    def _():
        def bn_silu(v, gamma, beta):
            mean = jnp.mean(v, axis=0, keepdims=True)
            var = jnp.mean((v - mean) ** 2, axis=0, keepdims=True)  # biased (torch BN fwd)
            return silu((v - mean) * jax.lax.rsqrt(var + eps) * gamma + beta)

        hh = h_ref[...]
        # predictor1: Linear -> BatchNorm1d -> SiLU -> Linear
        t = mm(hh, hw_ref[0]) + hv_ref[0:1, :]
        t = bn_silu(t, hv_ref[1:2, :], hv_ref[2:3, :])
        t = mm(t, hw_ref[1]) + hv_ref[3:4, :]
        # global_add_pool as one-hot matmul
        g = mm(pool_ref[...], t)
        # predictor2: Linear -> BatchNorm1d -> SiLU -> Linear(H, out)
        g = mm(g, hw_ref[2]) + hv_ref[4:5, :]
        g = bn_silu(g, hv_ref[5:6, :], hv_ref[6:7, :])
        out_ref[...] = mm(g, hw_ref[3]) + hv_ref[7:8, :]


# ----------------------------------------------------------------------------
# Parameter init (deterministic, synthetic) + packing into padded slabs
# ----------------------------------------------------------------------------
def _dense(key, fan_in, fan_out):
    kw, kb = jax.random.split(key)
    w = jax.random.normal(kw, (fan_in, fan_out), _F32) * (1.0 / jnp.sqrt(fan_in))
    b = jax.random.normal(kb, (fan_out,), _F32) * 0.01
    return w, b


def init_params(key, in_ch, hid, edge_dim, out_ch=1, num_layers=4):
    keys = jax.random.split(key, 8 + num_layers)
    p = {}
    p["first_w"], p["first_b"] = _dense(keys[0], in_ch, hid)

    p["layers"] = []
    msg_in = 2 * hid + 1 + edge_dim
    for l in range(num_layers):
        lk = jax.random.split(keys[1 + l], 4)
        lp = {}
        lp["msg_w1"], lp["msg_b1"] = _dense(lk[0], msg_in, hid)
        lp["msg_w2"], lp["msg_b2"] = _dense(lk[1], hid, hid)
        lp["upd_w1"], lp["upd_b1"] = _dense(lk[2], 2 * hid, hid)
        lp["upd_w2"], lp["upd_b2"] = _dense(lk[3], hid, hid)
        p["layers"].append(lp)

    k = 1 + num_layers
    p["p1_w1"], p["p1_b1"] = _dense(keys[k], hid, hid)
    p["p1_gamma"] = jnp.ones((hid,), _F32)
    p["p1_beta"] = jnp.zeros((hid,), _F32)
    p["p1_w2"], p["p1_b2"] = _dense(keys[k + 1], hid, hid)

    p["p2_w1"], p["p2_b1"] = _dense(keys[k + 2], hid, hid)
    p["p2_gamma"] = jnp.ones((hid,), _F32)
    p["p2_beta"] = jnp.zeros((hid,), _F32)
    p["p2_w2"], p["p2_b2"] = _dense(keys[k + 3], hid, out_ch)
    return p


def pack_params(p, hid, hp=HP):
    """Pad HID->128 (lane dense) and stack per-layer weights into slabs."""
    def pad_mat(w):
        return jnp.zeros((hp, hp), _F32).at[: w.shape[0], : w.shape[1]].set(w)

    def pad_vec(v):
        return jnp.zeros((hp,), _F32).at[: v.shape[0]].set(v)

    in_ch = p["first_w"].shape[0]
    w0 = jnp.zeros((in_ch, hp), _F32).at[:, :hid].set(p["first_w"])
    b0 = pad_vec(p["first_b"]).reshape(1, hp)

    wsq_list, bias_list = [], []
    for lp in p["layers"]:
        w1 = lp["msg_w1"]                       # rows: [h_dst | h_src | dist2 | edge_attr]
        w_hd, w_hs = w1[:hid], w1[hid:2 * hid]
        w_d = w1[2 * hid:2 * hid + 1]           # (1, H)
        w_e = w1[2 * hid + 1:]                  # (De, H)
        w_ed = jnp.concatenate([w_e, w_d], 0)   # matches efeat = [edge_attr, dist2]
        wu1 = lp["upd_w1"]                      # rows: [h | agg]
        mats = [w_hd, w_hs, w_ed, lp["msg_w2"], wu1[:hid], wu1[hid:], lp["upd_w2"]]
        wsq_list.append(jnp.stack([pad_mat(m) for m in mats]))        # (7, hp, hp)

        bias8 = jnp.zeros((8, hp), _F32)
        for i, b in enumerate([lp["msg_b1"], lp["msg_b2"], lp["upd_b1"], lp["upd_b2"]]):
            bias8 = bias8.at[i, : b.shape[0]].set(b)
        bias_list.append(bias8)                                       # (8, hp)

    packed = {
        "w0": w0, "b0": b0,
        "wsq": jnp.concatenate(wsq_list, axis=0),      # (L*7, hp, hp)
        "bias": jnp.concatenate(bias_list, axis=0),    # (L*8, hp)
        "hw": jnp.stack([pad_mat(p["p1_w1"]), pad_mat(p["p1_w2"]),
                         pad_mat(p["p2_w1"]), pad_mat(p["p2_w2"])]),  # (4, hp, hp)
        "hv": jnp.stack([pad_vec(p["p1_b1"]), pad_vec(p["p1_gamma"]),
                         pad_vec(p["p1_beta"]), pad_vec(p["p1_b2"]),
                         pad_vec(p["p2_b1"]), pad_vec(p["p2_gamma"]),
                         pad_vec(p["p2_beta"]), pad_vec(p["p2_b2"])]),  # (8, hp)
    }
    return packed


# ----------------------------------------------------------------------------
# EGNN forward: ONE pallas_call under jit
# ----------------------------------------------------------------------------
@functools.partial(jax.jit, static_argnames=("num_graphs",))
def egnn_forward(packed, x, edge_index, edge_attr, pos, batch, num_graphs):
    n, in_ch = x.shape
    e = edge_index.shape[1]
    hp = packed["w0"].shape[1]
    num_layers = packed["wsq"].shape[0] // 7
    src, dst = edge_index[0], edge_index[1]

    # Layer-invariant index machinery built once (exact 0/1 in f32).
    node_ids = jnp.arange(n, dtype=src.dtype)
    gsrc = (src[:, None] == node_ids[None, :]).astype(_F32)           # (E, N)
    gdst = (dst[:, None] == node_ids[None, :]).astype(_F32)           # (E, N)
    scat = gdst.T                                                     # (N, E)
    pool = (batch[None, :] ==
            jnp.arange(num_graphs, dtype=batch.dtype)[:, None]).astype(_F32)  # (G, N)

    # Layer-invariant geometric/edge features, padded lane-dense.
    rel = pos[src] - pos[dst]
    dist2 = jnp.sum(rel * rel, axis=-1, keepdims=True)                # (E, 1)
    efeat = jnp.concatenate([edge_attr, dist2], axis=-1)
    efeat = jnp.pad(efeat, ((0, 0), (0, hp - efeat.shape[1])))        # (E, hp)

    # Rough cost estimate so XLA can schedule the single custom call.
    def mmf(m, k, nn):
        return 2 * m * k * nn
    per_layer = (2 * mmf(n, hp, hp) + 2 * mmf(e, n, hp) + 2 * mmf(e, hp, hp)
                 + mmf(n, e, hp) + 3 * mmf(n, hp, hp))
    head = 2 * mmf(n, hp, hp) + mmf(num_graphs, n, hp) + 2 * mmf(num_graphs, hp, hp)
    flops = num_layers * per_layer + mmf(n, in_ch, hp) + head
    transc = num_layers * (2 * e * hp + 2 * n * hp) + 2 * n * hp + num_graphs * hp
    bytes_accessed = 4 * (x.size + efeat.size + gsrc.size + gdst.size + scat.size
                          + pool.size + sum(packed[k].size for k in
                                            ("w0", "b0", "wsq", "bias", "hw", "hv"))
                          + num_graphs * hp)
    cost = pl.CostEstimate(flops=int(flops), transcendentals=int(transc),
                           bytes_accessed=int(bytes_accessed))

    grid_spec = pltpu.PrefetchScalarGridSpec(
        num_scalar_prefetch=0,
        grid=(num_layers,),
        in_specs=[
            pl.BlockSpec((n, in_ch), lambda l: (0, 0)),            # x
            pl.BlockSpec((e, hp), lambda l: (0, 0)),               # efeat
            pl.BlockSpec((e, n), lambda l: (0, 0)),                # gsrc
            pl.BlockSpec((e, n), lambda l: (0, 0)),                # gdst
            pl.BlockSpec((n, e), lambda l: (0, 0)),                # scat
            pl.BlockSpec((num_graphs, n), lambda l: (0, 0)),       # pool
            pl.BlockSpec((in_ch, hp), lambda l: (0, 0)),           # w0
            pl.BlockSpec((1, hp), lambda l: (0, 0)),               # b0
            pl.BlockSpec((7, hp, hp), lambda l: (l, 0, 0)),        # per-layer weights
            pl.BlockSpec((8, hp), lambda l: (l, 0)),               # per-layer biases
            pl.BlockSpec((4, hp, hp), lambda l: (0, 0, 0)),        # head weights
            pl.BlockSpec((8, hp), lambda l: (0, 0)),               # head vectors
        ],
        out_specs=pl.BlockSpec((num_graphs, hp), lambda l: (0, 0)),
        scratch_shapes=[pltpu.VMEM((n, hp), _F32)],                # resident h
    )

    out = pl.pallas_call(
        functools.partial(_egnn_fused_kernel, eps=1e-5),
        grid_spec=grid_spec,
        out_shape=jax.ShapeDtypeStruct((num_graphs, hp), _F32),
        compiler_params=pltpu.CompilerParams(
            dimension_semantics=("arbitrary",),          # layer axis is sequential
            vmem_limit_bytes=32 * 1024 * 1024,
        ),
        cost_estimate=cost,
    )(x, efeat, gsrc, gdst, scat, pool,
      packed["w0"], packed["b0"], packed["wsq"], packed["bias"],
      packed["hw"], packed["hv"])

    return out[:, 0]   # only column 0 is the real (output_channels=1) prediction


# ----------------------------------------------------------------------------
# Main
# ----------------------------------------------------------------------------
if __name__ == "__main__":
    key = jax.random.PRNGKey(0)
    k_param, k_x, k_e, k_pos = jax.random.split(key, 4)

    IN_CH, HID, EDGE_DIM, OUT_CH, NUM_LAYERS = 8, 32, 4, 1, 4
    NODES_PER_GRAPH, NUM_GRAPHS = 8, 2
    N = NODES_PER_GRAPH * NUM_GRAPHS

    # deterministic ring-graph edges (bidirectional) per graph
    srcs, dsts = [], []
    for g in range(NUM_GRAPHS):
        base = g * NODES_PER_GRAPH
        for i in range(NODES_PER_GRAPH):
            a, b = base + i, base + (i + 1) % NODES_PER_GRAPH
            srcs += [a, b]
            dsts += [b, a]
    edge_index = jnp.array([srcs, dsts], dtype=jnp.int32)   # (2, E)
    E = edge_index.shape[1]

    x = jax.random.normal(k_x, (N, IN_CH), _F32)
    edge_attr = jax.random.normal(k_e, (E, EDGE_DIM), _F32)
    pos = jax.random.normal(k_pos, (N, 3), _F32)
    batch = jnp.repeat(jnp.arange(NUM_GRAPHS, dtype=jnp.int32), NODES_PER_GRAPH)

    params = init_params(k_param, IN_CH, HID, EDGE_DIM, OUT_CH, NUM_LAYERS)
    packed = pack_params(params, HID)

    out = egnn_forward(packed, x, edge_index, edge_attr, pos, batch, NUM_GRAPHS)
    out = jax.block_until_ready(out)
    assert out.shape == (NUM_GRAPHS,)
    assert bool(jnp.all(jnp.isfinite(out)))
    print("KERNEL_OK")
</pallas_src>

<mosaic_0001>
module attributes {stable_mosaic.version = 11 : i64} {
  func.func @_egnn_fused_kernel(%arg0: i32, %arg1: memref<16x8xf32, #tpu.memory_space<vmem>>, %arg2: memref<32x128xf32, #tpu.memory_space<vmem>>, %arg3: memref<32x16xf32, #tpu.memory_space<vmem>>, %arg4: memref<32x16xf32, #tpu.memory_space<vmem>>, %arg5: memref<16x32xf32, #tpu.memory_space<vmem>>, %arg6: memref<2x16xf32, #tpu.memory_space<vmem>>, %arg7: memref<8x128xf32, #tpu.memory_space<vmem>>, %arg8: memref<1x128xf32, #tpu.memory_space<vmem>>, %arg9: memref<7x128x128xf32, #tpu.memory_space<vmem>>, %arg10: memref<8x128xf32, #tpu.memory_space<vmem>>, %arg11: memref<4x128x128xf32, #tpu.memory_space<vmem>>, %arg12: memref<8x128xf32, #tpu.memory_space<vmem>>, %arg13: memref<2x128xf32, #tpu.memory_space<vmem>>, %arg14: memref<16x128xf32, #tpu.memory_space<vmem>>) attributes {dimension_semantics = [#tpu.dimension_semantics<arbitrary>], iteration_bounds = array<i64: 4>, scalar_prefetch = 0 : i64, scratch_operands = 1 : i64, tpu.core_type = #tpu.core_type<tc>, window_params = [{pipeline_mode = #tpu.pipeline_mode<synchronous>, transform_indices = @transform_0, window_bounds = array<i64: 16, 8>}, {pipeline_mode = #tpu.pipeline_mode<synchronous>, transform_indices = @transform_1, window_bounds = array<i64: 32, 128>}, {pipeline_mode = #tpu.pipeline_mode<synchronous>, transform_indices = @transform_2, window_bounds = array<i64: 32, 16>}, {pipeline_mode = #tpu.pipeline_mode<synchronous>, transform_indices = @transform_3, window_bounds = array<i64: 32, 16>}, {pipeline_mode = #tpu.pipeline_mode<synchronous>, transform_indices = @transform_4, window_bounds = array<i64: 16, 32>}, {pipeline_mode = #tpu.pipeline_mode<synchronous>, transform_indices = @transform_5, window_bounds = array<i64: 2, 16>}, {pipeline_mode = #tpu.pipeline_mode<synchronous>, transform_indices = @transform_6, window_bounds = array<i64: 8, 128>}, {pipeline_mode = #tpu.pipeline_mode<synchronous>, transform_indices = @transform_7, window_bounds = array<i64: 1, 128>}, {transform_indices = @transform_8, window_bounds = array<i64: 7, 128, 128>}, {transform_indices = @transform_9, window_bounds = array<i64: 8, 128>}, {pipeline_mode = #tpu.pipeline_mode<synchronous>, transform_indices = @transform_10, window_bounds = array<i64: 4, 128, 128>}, {pipeline_mode = #tpu.pipeline_mode<synchronous>, transform_indices = @transform_11, window_bounds = array<i64: 8, 128>}, {pipeline_mode = #tpu.pipeline_mode<synchronous>, transform_indices = @transform_12, window_bounds = array<i64: 2, 128>}]} {
    %c0_i32 = arith.constant 0 : i32
    %0 = arith.cmpi eq, %arg0, %c0_i32 : i32
    %1 = arith.extui %0 : i1 to i32
    %c0_i32_0 = arith.constant 0 : i32
    %2 = arith.cmpi ne, %1, %c0_i32_0 : i32
    scf.if %2 {
      %c0_48 = arith.constant 0 : index
      %c0_49 = arith.constant 0 : index
      %70 = vector.load %arg1[%c0_48, %c0_49] : memref<16x8xf32, #tpu.memory_space<vmem>>, vector<16x8xf32>
      %c0_50 = arith.constant 0 : index
      %c0_51 = arith.constant 0 : index
      %71 = vector.load %arg7[%c0_50, %c0_51] : memref<8x128xf32, #tpu.memory_space<vmem>>, vector<8x128xf32>
      %cst_52 = arith.constant dense<0.000000e+00> : vector<16x128xf32>
      %72 = tpu.matmul %70, %71, %cst_52 {dimension_numbers = #tpu.dot_dimension_numbers<[1], [0], [0], [1], [0, 0, 1, 1], [], []>} : vector<16x8xf32>, vector<8x128xf32>, vector<16x128xf32> -> vector<16x128xf32>
      %c0_53 = arith.constant 0 : index
      %c0_54 = arith.constant 0 : index
      %73 = vector.load %arg8[%c0_53, %c0_54] : memref<1x128xf32, #tpu.memory_space<vmem>>, vector<1x128xf32>
      %74 = vector.broadcast %73 : vector<1x128xf32> to vector<16x128xf32>
      %75 = arith.addf %72, %74 : vector<16x128xf32>
      %76 = arith.negf %75 : vector<16x128xf32>
      %77 = math.exp %76 : vector<16x128xf32>
      %cst_55 = arith.constant 1.000000e+00 : f32
      %78 = vector.broadcast %cst_55 : f32 to vector<16x128xf32>
      %79 = arith.addf %78, %77 : vector<16x128xf32>
      %80 = arith.divf %78, %79 : vector<16x128xf32>
      %81 = arith.mulf %75, %80 : vector<16x128xf32>
      %c0_56 = arith.constant 0 : index
      %c0_57 = arith.constant 0 : index
      %82 = vector.load %arg14[%c0_56, %c0_57] : memref<16x128xf32, #tpu.memory_space<vmem>>, vector<16x128xf32>
      tpu.vector_store %arg14[%c0_56, %c0_57], %81 {strides = array<i32>} : memref<16x128xf32, #tpu.memory_space<vmem>>, vector<16x128xf32>,
    } else {
    }
    %c0 = arith.constant 0 : index
    %c0_1 = arith.constant 0 : index
    %3 = vector.load %arg14[%c0, %c0_1] : memref<16x128xf32, #tpu.memory_space<vmem>>, vector<16x128xf32>
    %c0_2 = arith.constant 0 : index
    %c0_3 = arith.constant 0 : index
    %c0_4 = arith.constant 0 : index
    %4 = vector.load %arg9[%c0_2, %c0_3, %c0_4] : memref<7x128x128xf32, #tpu.memory_space<vmem>>, vector<1x128x128xf32>
    %5 = vector.shape_cast %4 : vector<1x128x128xf32> to vector<128x128xf32>
    %cst = arith.constant dense<0.000000e+00> : vector<16x128xf32>
    %6 = tpu.matmul %3, %5, %cst {dimension_numbers = #tpu.dot_dimension_numbers<[1], [0], [0], [1], [0, 0, 1, 1], [], []>} : vector<16x128xf32>, vector<128x128xf32>, vector<16x128xf32> -> vector<16x128xf32>
    %c1 = arith.constant 1 : index
    %c0_5 = arith.constant 0 : index
    %c0_6 = arith.constant 0 : index
    %7 = vector.load %arg9[%c1, %c0_5, %c0_6] : memref<7x128x128xf32, #tpu.memory_space<vmem>>, vector<1x128x128xf32>
    %8 = vector.shape_cast %7 : vector<1x128x128xf32> to vector<128x128xf32>
    %cst_7 = arith.constant dense<0.000000e+00> : vector<16x128xf32>
    %9 = tpu.matmul %3, %8, %cst_7 {dimension_numbers = #tpu.dot_dimension_numbers<[1], [0], [0], [1], [0, 0, 1, 1], [], []>} : vector<16x128xf32>, vector<128x128xf32>, vector<16x128xf32> -> vector<16x128xf32>
    %c0_8 = arith.constant 0 : index
    %c0_9 = arith.constant 0 : index
    %10 = vector.load %arg4[%c0_8, %c0_9] : memref<32x16xf32, #tpu.memory_space<vmem>>, vector<32x16xf32>
    %cst_10 = arith.constant dense<0.000000e+00> : vector<32x128xf32>
    %11 = tpu.matmul %10, %6, %cst_10 {dimension_numbers = #tpu.dot_dimension_numbers<[1], [0], [0], [1], [0, 0, 1, 1], [], []>} : vector<32x16xf32>, vector<16x128xf32>, vector<32x128xf32> -> vector<32x128xf32>
    %c0_11 = arith.constant 0 : index
    %c0_12 = arith.constant 0 : index
    %12 = vector.load %arg3[%c0_11, %c0_12] : memref<32x16xf32, #tpu.memory_space<vmem>>, vector<32x16xf32>
    %cst_13 = arith.constant dense<0.000000e+00> : vector<32x128xf32>
    %13 = tpu.matmul %12, %9, %cst_13 {dimension_numbers = #tpu.dot_dimension_numbers<[1], [0], [0], [1], [0, 0, 1, 1], [], []>} : vector<32x16xf32>, vector<16x128xf32>, vector<32x128xf32> -> vector<32x128xf32>
    %14 = arith.addf %11, %13 : vector<32x128xf32>
    %c0_14 = arith.constant 0 : index
    %c0_15 = arith.constant 0 : index
    %15 = vector.load %arg2[%c0_14, %c0_15] : memref<32x128xf32, #tpu.memory_space<vmem>>, vector<32x128xf32>
    %c2 = arith.constant 2 : index
    %c0_16 = arith.constant 0 : index
    %c0_17 = arith.constant 0 : index
    %16 = vector.load %arg9[%c2, %c0_16, %c0_17] : memref<7x128x128xf32, #tpu.memory_space<vmem>>, vector<1x128x128xf32>
    %17 = vector.shape_cast %16 : vector<1x128x128xf32> to vector<128x128xf32>
    %cst_18 = arith.constant dense<0.000000e+00> : vector<32x128xf32>
    %18 = tpu.matmul %15, %17, %cst_18 {dimension_numbers = #tpu.dot_dimension_numbers<[1], [0], [0], [1], [0, 0, 1, 1], [], []>} : vector<32x128xf32>, vector<128x128xf32>, vector<32x128xf32> -> vector<32x128xf32>
    %19 = arith.addf %14, %18 : vector<32x128xf32>
    %c0_19 = arith.constant 0 : index
    %c0_20 = arith.constant 0 : index
    %20 = vector.load %arg10[%c0_19, %c0_20] : memref<8x128xf32, #tpu.memory_space<vmem>>, vector<1x128xf32>
    %21 = vector.broadcast %20 : vector<1x128xf32> to vector<32x128xf32>
    %22 = arith.addf %19, %21 : vector<32x128xf32>
    %23 = arith.negf %22 : vector<32x128xf32>
    %24 = math.exp %23 : vector<32x128xf32>
    %cst_21 = arith.constant 1.000000e+00 : f32
    %25 = vector.broadcast %cst_21 : f32 to vector<32x128xf32>
    %26 = arith.addf %25, %24 : vector<32x128xf32>
    %27 = arith.divf %25, %26 : vector<32x128xf32>
    %28 = arith.mulf %22, %27 : vector<32x128xf32>
    %c3 = arith.constant 3 : index
    %c0_22 = arith.constant 0 : index
    %c0_23 = arith.constant 0 : index
    %29 = vector.load %arg9[%c3, %c0_22, %c0_23] : memref<7x128x128xf32, #tpu.memory_space<vmem>>, vector<1x128x128xf32>
    %30 = vector.shape_cast %29 : vector<1x128x128xf32> to vector<128x128xf32>
    %cst_24 = arith.constant dense<0.000000e+00> : vector<32x128xf32>
    %31 = tpu.matmul %28, %30, %cst_24 {dimension_numbers = #tpu.dot_dimension_numbers<[1], [0], [0], [1], [0, 0, 1, 1], [], []>} : vector<32x128xf32>, vector<128x128xf32>, vector<32x128xf32> -> vector<32x128xf32>
    %c1_25 = arith.constant 1 : index
    %c0_26 = arith.constant 0 : index
    %32 = vector.load %arg10[%c1_25, %c0_26] : memref<8x128xf32, #tpu.memory_space<vmem>>, vector<1x128xf32>
    %33 = vector.broadcast %32 : vector<1x128xf32> to vector<32x128xf32>
    %34 = arith.addf %31, %33 : vector<32x128xf32>
    %35 = arith.negf %34 : vector<32x128xf32>
    %36 = math.exp %35 : vector<32x128xf32>
    %cst_27 = arith.constant 1.000000e+00 : f32
    %37 = vector.broadcast %cst_27 : f32 to vector<32x128xf32>
    %38 = arith.addf %37, %36 : vector<32x128xf32>
    %39 = arith.divf %37, %38 : vector<32x128xf32>
    %40 = arith.mulf %34, %39 : vector<32x128xf32>
    %c0_28 = arith.constant 0 : index
    %c0_29 = arith.constant 0 : index
    %41 = vector.load %arg5[%c0_28, %c0_29] : memref<16x32xf32, #tpu.memory_space<vmem>>, vector<16x32xf32>
    %cst_30 = arith.constant dense<0.000000e+00> : vector<16x128xf32>
    %42 = tpu.matmul %41, %40, %cst_30 {dimension_numbers = #tpu.dot_dimension_numbers<[1], [0], [0], [1], [0, 0, 1, 1], [], []>} : vector<16x32xf32>, vector<32x128xf32>, vector<16x128xf32> -> vector<16x128xf32>
    %c4 = arith.constant 4 : index
    %c0_31 = arith.constant 0 : index
    %c0_32 = arith.constant 0 : index
    %43 = vector.load %arg9[%c4, %c0_31, %c0_32] : memref<7x128x128xf32, #tpu.memory_space<vmem>>, vector<1x128x128xf32>
    %44 = vector.shape_cast %43 : vector<1x128x128xf32> to vector<128x128xf32>
    %cst_33 = arith.constant dense<0.000000e+00> : vector<16x128xf32>
    %45 = tpu.matmul %3, %44, %cst_33 {dimension_numbers = #tpu.dot_dimension_numbers<[1], [0], [0], [1], [0, 0, 1, 1], [], []>} : vector<16x128xf32>, vector<128x128xf32>, vector<16x128xf32> -> vector<16x128xf32>
    %c5 = arith.constant 5 : index
    %c0_34 = arith.constant 0 : index
    %c0_35 = arith.constant 0 : index
    %46 = vector.load %arg9[%c5, %c0_34, %c0_35] : memref<7x128x128xf32, #tpu.memory_space<vmem>>, vector<1x128x128xf32>
    %47 = vector.shape_cast %46 : vector<1x128x128xf32> to vector<128x128xf32>
    %cst_36 = arith.constant dense<0.000000e+00> : vector<16x128xf32>
    %48 = tpu.matmul %42, %47, %cst_36 {dimension_numbers = #tpu.dot_dimension_numbers<[1], [0], [0], [1], [0, 0, 1, 1], [], []>} : vector<16x128xf32>, vector<128x128xf32>, vector<16x128xf32> -> vector<16x128xf32>
    %49 = arith.addf %45, %48 : vector<16x128xf32>
    %c2_37 = arith.constant 2 : index
    %c0_38 = arith.constant 0 : index
    %50 = vector.load %arg10[%c2_37, %c0_38] : memref<8x128xf32, #tpu.memory_space<vmem>>, vector<1x128xf32>
    %51 = vector.broadcast %50 : vector<1x128xf32> to vector<16x128xf32>
    %52 = arith.addf %49, %51 : vector<16x128xf32>
    %53 = arith.negf %52 : vector<16x128xf32>
    %54 = math.exp %53 : vector<16x128xf32>
    %cst_39 = arith.constant 1.000000e+00 : f32
    %55 = vector.broadcast %cst_39 : f32 to vector<16x128xf32>
    %56 = arith.addf %55, %54 : vector<16x128xf32>
    %57 = arith.divf %55, %56 : vector<16x128xf32>
    %58 = arith.mulf %52, %57 : vector<16x128xf32>
    %c6 = arith.constant 6 : index
    %c0_40 = arith.constant 0 : index
    %c0_41 = arith.constant 0 : index
    %59 = vector.load %arg9[%c6, %c0_40, %c0_41] : memref<7x128x128xf32, #tpu.memory_space<vmem>>, vector<1x128x128xf32>
    %60 = vector.shape_cast %59 : vector<1x128x128xf32> to vector<128x128xf32>
    %cst_42 = arith.constant dense<0.000000e+00> : vector<16x128xf32>
    %61 = tpu.matmul %58, %60, %cst_42 {dimension_numbers = #tpu.dot_dimension_numbers<[1], [0], [0], [1], [0, 0, 1, 1], [], []>} : vector<16x128xf32>, vector<128x128xf32>, vector<16x128xf32> -> vector<16x128xf32>
    %c3_43 = arith.constant 3 : index
    %c0_44 = arith.constant 0 : index
    %62 = vector.load %arg10[%c3_43, %c0_44] : memref<8x128xf32, #tpu.memory_space<vmem>>, vector<1x128xf32>
    %63 = vector.broadcast %62 : vector<1x128xf32> to vector<16x128xf32>
    %64 = arith.addf %61, %63 : vector<16x128xf32>
    %65 = arith.addf %3, %64 : vector<16x128xf32>
    %c0_45 = arith.constant 0 : index
    %c0_46 = arith.constant 0 : index
    %66 = vector.load %arg14[%c0_45, %c0_46] : memref<16x128xf32, #tpu.memory_space<vmem>>, vector<16x128xf32>
    tpu.vector_store %arg14[%c0_45, %c0_46], %65 {strides = array<i32>} : memref<16x128xf32, #tpu.memory_space<vmem>>, vector<16x128xf32>,
    %c3_i32 = arith.constant 3 : i32
    %67 = arith.cmpi eq, %arg0, %c3_i32 : i32
    %68 = arith.extui %67 : i1 to i32
    %c0_i32_47 = arith.constant 0 : i32
    %69 = arith.cmpi ne, %68, %c0_i32_47 : i32
    scf.if %69 {
      %c0_48 = arith.constant 0 : index
      %c0_49 = arith.constant 0 : index
      %70 = vector.load %arg14[%c0_48, %c0_49] : memref<16x128xf32, #tpu.memory_space<vmem>>, vector<16x128xf32>
      %c0_50 = arith.constant 0 : index
      %c0_51 = arith.constant 0 : index
      %c0_52 = arith.constant 0 : index
      %71 = vector.load %arg11[%c0_50, %c0_51, %c0_52] : memref<4x128x128xf32, #tpu.memory_space<vmem>>, vector<1x128x128xf32>
      %72 = vector.shape_cast %71 : vector<1x128x128xf32> to vector<128x128xf32>
      %cst_53 = arith.constant dense<0.000000e+00> : vector<16x128xf32>
      %73 = tpu.matmul %70, %72, %cst_53 {dimension_numbers = #tpu.dot_dimension_numbers<[1], [0], [0], [1], [0, 0, 1, 1], [], []>} : vector<16x128xf32>, vector<128x128xf32>, vector<16x128xf32> -> vector<16x128xf32>
      %c0_54 = arith.constant 0 : index
      %c0_55 = arith.constant 0 : index
      %74 = vector.load %arg12[%c0_54, %c0_55] : memref<8x128xf32, #tpu.memory_space<vmem>>, vector<1x128xf32>
      %75 = vector.broadcast %74 : vector<1x128xf32> to vector<16x128xf32>
      %76 = arith.addf %73, %75 : vector<16x128xf32>
      %c1_56 = arith.constant 1 : index
      %c0_57 = arith.constant 0 : index
      %77 = vector.load %arg12[%c1_56, %c0_57] : memref<8x128xf32, #tpu.memory_space<vmem>>, vector<1x128xf32>
      %c2_58 = arith.constant 2 : index
      %c0_59 = arith.constant 0 : index
      %78 = vector.load %arg12[%c2_58, %c0_59] : memref<8x128xf32, #tpu.memory_space<vmem>>, vector<1x128xf32>
      %cst_60 = arith.constant dense<0.000000e+00> : vector<128xf32>
      %79 = vector.multi_reduction <add>, %76, %cst_60 [0] : vector<16x128xf32> to vector<128xf32>
      %80 = vector.shape_cast %79 : vector<128xf32> to vector<1x128xf32>
      %cst_61 = arith.constant 1.600000e+01 : f32
      %81 = vector.broadcast %cst_61 : f32 to vector<1x128xf32>
      %82 = arith.divf %80, %81 : vector<1x128xf32>
      %83 = vector.broadcast %82 : vector<1x128xf32> to vector<16x128xf32>
      %84 = arith.subf %76, %83 : vector<16x128xf32>
      %85 = arith.mulf %84, %84 : vector<16x128xf32>
      %cst_62 = arith.constant dense<0.000000e+00> : vector<128xf32>
      %86 = vector.multi_reduction <add>, %85, %cst_62 [0] : vector<16x128xf32> to vector<128xf32>
      %87 = vector.shape_cast %86 : vector<128xf32> to vector<1x128xf32>
      %cst_63 = arith.constant 1.600000e+01 : f32
      %88 = vector.broadcast %cst_63 : f32 to vector<1x128xf32>
      %89 = arith.divf %87, %88 : vector<1x128xf32>
      %90 = vector.broadcast %82 : vector<1x128xf32> to vector<16x128xf32>
      %91 = arith.subf %76, %90 : vector<16x128xf32>
      %cst_64 = arith.constant 9.99999974E-6 : f32
      %92 = vector.broadcast %cst_64 : f32 to vector<1x128xf32>
      %93 = arith.addf %89, %92 : vector<1x128xf32>
      %94 = math.rsqrt %93 : vector<1x128xf32>
      %95 = vector.broadcast %94 : vector<1x128xf32> to vector<16x128xf32>
      %96 = arith.mulf %91, %95 : vector<16x128xf32>
      %97 = vector.broadcast %77 : vector<1x128xf32> to vector<16x128xf32>
      %98 = arith.mulf %96, %97 : vector<16x128xf32>
      %99 = vector.broadcast %78 : vector<1x128xf32> to vector<16x128xf32>
      %100 = arith.addf %98, %99 : vector<16x128xf32>
      %101 = arith.negf %100 : vector<16x128xf32>
      %102 = math.exp %101 : vector<16x128xf32>
      %cst_65 = arith.constant 1.000000e+00 : f32
      %103 = vector.broadcast %cst_65 : f32 to vector<16x128xf32>
      %104 = arith.addf %103, %102 : vector<16x128xf32>
      %105 = arith.divf %103, %104 : vector<16x128xf32>
      %106 = arith.mulf %100, %105 : vector<16x128xf32>
      %c1_66 = arith.constant 1 : index
      %c0_67 = arith.constant 0 : index
      %c0_68 = arith.constant 0 : index
      %107 = vector.load %arg11[%c1_66, %c0_67, %c0_68] : memref<4x128x128xf32, #tpu.memory_space<vmem>>, vector<1x128x128xf32>
      %108 = vector.shape_cast %107 : vector<1x128x128xf32> to vector<128x128xf32>
      %cst_69 = arith.constant dense<0.000000e+00> : vector<16x128xf32>
      %109 = tpu.matmul %106, %108, %cst_69 {dimension_numbers = #tpu.dot_dimension_numbers<[1], [0], [0], [1], [0, 0, 1, 1], [], []>} : vector<16x128xf32>, vector<128x128xf32>, vector<16x128xf32> -> vector<16x128xf32>
      %c3_70 = arith.constant 3 : index
      %c0_71 = arith.constant 0 : index
      %110 = vector.load %arg12[%c3_70, %c0_71] : memref<8x128xf32, #tpu.memory_space<vmem>>, vector<1x128xf32>
      %111 = vector.broadcast %110 : vector<1x128xf32> to vector<16x128xf32>
      %112 = arith.addf %109, %111 : vector<16x128xf32>
      %c0_72 = arith.constant 0 : index
      %c0_73 = arith.constant 0 : index
      %113 = vector.load %arg6[%c0_72, %c0_73] : memref<2x16xf32, #tpu.memory_space<vmem>>, vector<2x16xf32>
      %cst_74 = arith.constant dense<0.000000e+00> : vector<2x128xf32>
      %114 = tpu.matmul %113, %112, %cst_74 {dimension_numbers = #tpu.dot_dimension_numbers<[1], [0], [0], [1], [0, 0, 1, 1], [], []>} : vector<2x16xf32>, vector<16x128xf32>, vector<2x128xf32> -> vector<2x128xf32>
      %c2_75 = arith.constant 2 : index
      %c0_76 = arith.constant 0 : index
      %c0_77 = arith.constant 0 : index
      %115 = vector.load %arg11[%c2_75, %c0_76, %c0_77] : memref<4x128x128xf32, #tpu.memory_space<vmem>>, vector<1x128x128xf32>
      %116 = vector.shape_cast %115 : vector<1x128x128xf32> to vector<128x128xf32>
      %cst_78 = arith.constant dense<0.000000e+00> : vector<2x128xf32>
      %117 = tpu.matmul %114, %116, %cst_78 {dimension_numbers = #tpu.dot_dimension_numbers<[1], [0], [0], [1], [0, 0, 1, 1], [], []>} : vector<2x128xf32>, vector<128x128xf32>, vector<2x128xf32> -> vector<2x128xf32>
      %c4_79 = arith.constant 4 : index
      %c0_80 = arith.constant 0 : index
      %118 = vector.load %arg12[%c4_79, %c0_80] : memref<8x128xf32, #tpu.memory_space<vmem>>, vector<1x128xf32>
      %119 = vector.broadcast %118 : vector<1x128xf32> to vector<2x128xf32>
      %120 = arith.addf %117, %119 : vector<2x128xf32>
      %c5_81 = arith.constant 5 : index
      %c0_82 = arith.constant 0 : index
      %121 = vector.load %arg12[%c5_81, %c0_82] : memref<8x128xf32, #tpu.memory_space<vmem>>, vector<1x128xf32>
      %c6_83 = arith.constant 6 : index
      %c0_84 = arith.constant 0 : index
      %122 = vector.load %arg12[%c6_83, %c0_84] : memref<8x128xf32, #tpu.memory_space<vmem>>, vector<1x128xf32>
      %cst_85 = arith.constant dense<0.000000e+00> : vector<128xf32>
      %123 = vector.multi_reduction <add>, %120, %cst_85 [0] : vector<2x128xf32> to vector<128xf32>
      %124 = vector.shape_cast %123 : vector<128xf32> to vector<1x128xf32>
      %cst_86 = arith.constant 2.000000e+00 : f32
      %125 = vector.broadcast %cst_86 : f32 to vector<1x128xf32>
      %126 = arith.divf %124, %125 : vector<1x128xf32>
      %127 = vector.broadcast %126 : vector<1x128xf32> to vector<2x128xf32>
      %128 = arith.subf %120, %127 : vector<2x128xf32>
      %129 = arith.mulf %128, %128 : vector<2x128xf32>
      %cst_87 = arith.constant dense<0.000000e+00> : vector<128xf32>
      %130 = vector.multi_reduction <add>, %129, %cst_87 [0] : vector<2x128xf32> to vector<128xf32>
      %131 = vector.shape_cast %130 : vector<128xf32> to vector<1x128xf32>
      %cst_88 = arith.constant 2.000000e+00 : f32
      %132 = vector.broadcast %cst_88 : f32 to vector<1x128xf32>
      %133 = arith.divf %131, %132 : vector<1x128xf32>
      %134 = vector.broadcast %126 : vector<1x128xf32> to vector<2x128xf32>
      %135 = arith.subf %120, %134 : vector<2x128xf32>
      %cst_89 = arith.constant 9.99999974E-6 : f32
      %136 = vector.broadcast %cst_89 : f32 to vector<1x128xf32>
      %137 = arith.addf %133, %136 : vector<1x128xf32>
      %138 = math.rsqrt %137 : vector<1x128xf32>
      %139 = vector.broadcast %138 : vector<1x128xf32> to vector<2x128xf32>
      %140 = arith.mulf %135, %139 : vector<2x128xf32>
      %141 = vector.broadcast %121 : vector<1x128xf32> to vector<2x128xf32>
      %142 = arith.mulf %140, %141 : vector<2x128xf32>
      %143 = vector.broadcast %122 : vector<1x128xf32> to vector<2x128xf32>
      %144 = arith.addf %142, %143 : vector<2x128xf32>
      %145 = arith.negf %144 : vector<2x128xf32>
      %146 = math.exp %145 : vector<2x128xf32>
      %cst_90 = arith.constant 1.000000e+00 : f32
      %147 = vector.broadcast %cst_90 : f32 to vector<2x128xf32>
      %148 = arith.addf %147, %146 : vector<2x128xf32>
      %149 = arith.divf %147, %148 : vector<2x128xf32>
      %150 = arith.mulf %144, %149 : vector<2x128xf32>
      %c3_91 = arith.constant 3 : index
      %c0_92 = arith.constant 0 : index
      %c0_93 = arith.constant 0 : index
      %151 = vector.load %arg11[%c3_91, %c0_92, %c0_93] : memref<4x128x128xf32, #tpu.memory_space<vmem>>, vector<1x128x128xf32>
      %152 = vector.shape_cast %151 : vector<1x128x128xf32> to vector<128x128xf32>
      %cst_94 = arith.constant dense<0.000000e+00> : vector<2x128xf32>
      %153 = tpu.matmul %150, %152, %cst_94 {dimension_numbers = #tpu.dot_dimension_numbers<[1], [0], [0], [1], [0, 0, 1, 1], [], []>} : vector<2x128xf32>, vector<128x128xf32>, vector<2x128xf32> -> vector<2x128xf32>
      %c7 = arith.constant 7 : index
      %c0_95 = arith.constant 0 : index
      %154 = vector.load %arg12[%c7, %c0_95] : memref<8x128xf32, #tpu.memory_space<vmem>>, vector<1x128xf32>
      %155 = vector.broadcast %154 : vector<1x128xf32> to vector<2x128xf32>
      %156 = arith.addf %153, %155 : vector<2x128xf32>
      %c0_96 = arith.constant 0 : index
      %c0_97 = arith.constant 0 : index
      %157 = vector.load %arg13[%c0_96, %c0_97] : memref<2x128xf32, #tpu.memory_space<vmem>>, vector<2x128xf32>
      tpu.vector_store %arg13[%c0_96, %c0_97], %156 {strides = array<i32>} : memref<2x128xf32, #tpu.memory_space<vmem>>, vector<2x128xf32>,
    } else {
    }
    return
  }
  func.func @transform_0(%arg0: i32) -> (i32, i32) {
    %c0_i32 = arith.constant 0 : i32
    %c0_i32_0 = arith.constant 0 : i32
    %c0_i32_1 = arith.constant 0 : i32
    return %c0_i32, %c0_i32_0 : i32, i32
  }
  func.func @transform_1(%arg0: i32) -> (i32, i32) {
    %c0_i32 = arith.constant 0 : i32
    %c0_i32_0 = arith.constant 0 : i32
    %c0_i32_1 = arith.constant 0 : i32
    return %c0_i32, %c0_i32_0 : i32, i32
  }
  func.func @transform_2(%arg0: i32) -> (i32, i32) {
    %c0_i32 = arith.constant 0 : i32
    %c0_i32_0 = arith.constant 0 : i32
    %c0_i32_1 = arith.constant 0 : i32
    return %c0_i32, %c0_i32_0 : i32, i32
  }
  func.func @transform_3(%arg0: i32) -> (i32, i32) {
    %c0_i32 = arith.constant 0 : i32
    %c0_i32_0 = arith.constant 0 : i32
    %c0_i32_1 = arith.constant 0 : i32
    return %c0_i32, %c0_i32_0 : i32, i32
  }
  func.func @transform_4(%arg0: i32) -> (i32, i32) {
    %c0_i32 = arith.constant 0 : i32
    %c0_i32_0 = arith.constant 0 : i32
    %c0_i32_1 = arith.constant 0 : i32
    return %c0_i32, %c0_i32_0 : i32, i32
  }
  func.func @transform_5(%arg0: i32) -> (i32, i32) {
    %c0_i32 = arith.constant 0 : i32
    %c0_i32_0 = arith.constant 0 : i32
    %c0_i32_1 = arith.constant 0 : i32
    return %c0_i32, %c0_i32_0 : i32, i32
  }
  func.func @transform_6(%arg0: i32) -> (i32, i32) {
    %c0_i32 = arith.constant 0 : i32
    %c0_i32_0 = arith.constant 0 : i32
    %c0_i32_1 = arith.constant 0 : i32
    return %c0_i32, %c0_i32_0 : i32, i32
  }
  func.func @transform_7(%arg0: i32) -> (i32, i32) {
    %c0_i32 = arith.constant 0 : i32
    %c0_i32_0 = arith.constant 0 : i32
    %c0_i32_1 = arith.constant 0 : i32
    return %c0_i32, %c0_i32_0 : i32, i32
  }
  func.func @transform_8(%arg0: i32) -> (i32, i32, i32) {
    %c0_i32 = arith.constant 0 : i32
    %c0_i32_0 = arith.constant 0 : i32
    %c0_i32_1 = arith.constant 0 : i32
    return %arg0, %c0_i32, %c0_i32_0 : i32, i32, i32
  }
  func.func @transform_9(%arg0: i32) -> (i32, i32) {
    %c0_i32 = arith.constant 0 : i32
    %c0_i32_0 = arith.constant 0 : i32
    return %arg0, %c0_i32 : i32, i32
  }
  func.func @transform_10(%arg0: i32) -> (i32, i32, i32) {
    %c0_i32 = arith.constant 0 : i32
    %c0_i32_0 = arith.constant 0 : i32
    %c0_i32_1 = arith.constant 0 : i32
    %c0_i32_2 = arith.constant 0 : i32
    return %c0_i32, %c0_i32_0, %c0_i32_1 : i32, i32, i32
  }
  func.func @transform_11(%arg0: i32) -> (i32, i32) {
    %c0_i32 = arith.constant 0 : i32
    %c0_i32_0 = arith.constant 0 : i32
    %c0_i32_1 = arith.constant 0 : i32
    return %c0_i32, %c0_i32_0 : i32, i32
  }
  func.func @transform_12(%arg0: i32) -> (i32, i32) {
    %c0_i32 = arith.constant 0 : i32
    %c0_i32_0 = arith.constant 0 : i32
    %c0_i32_1 = arith.constant 0 : i32
    return %c0_i32, %c0_i32_0 : i32, i32
  }
}

</mosaic_0001>

<bundles_post_ra>
// kernel: egnn_forward.1
= control target key start
LH: loop header
LB: loop body
LE: loop exit
PB: predicated region body
PF: predicated region fallthrough
CT: control target
= control target key end

     0   :  { %s4020_s0 = inlined_call_operand.vmem [shape: f32[16,8], index: 0, kind: input, shape index: {}]   ;;  %s4021_s1 = inlined_call_operand.vmem [shape: f32[32,128], index: 1, kind: input, shape index: {}]   ;;  %s4022_s2 = inlined_call_operand.vmem [shape: f32[32,16], index: 2, kind: input, shape index: {}]   ;;  %s4023_s3 = inlined_call_operand.vmem [shape: f32[32,16], index: 3, kind: input, shape index: {}]   ;;  %s4024_s4 = inlined_call_operand.vmem [shape: f32[16,32], index: 4, kind: input, shape index: {}]   ;;  %s4025_s5 = inlined_call_operand.vmem [shape: f32[2,16], index: 5, kind: input, shape index: {}]   ;;  %s4026_s6 = inlined_call_operand.hbm [shape: f32[8,128], index: 6, kind: input, shape index: {}]   ;;  %s4027_s7 = inlined_call_operand.hbm [shape: f32[1,128], index: 7, kind: input, shape index: {}]   ;;  %s4028_s8 = inlined_call_operand.hbm [shape: f32[28,128,128], index: 8, kind: input, shape index: {}]   ;;  %s4029_s9 = inlined_call_operand.hbm [shape: f32[32,128], index: 9, kind: input, shape index: {}]   ;;  %s4030_s10 = inlined_call_operand.hbm [shape: f32[4,128,128], index: 10, kind: input, shape index: {}]   ;;  %s4031_s11 = inlined_call_operand.hbm [shape: f32[8,128], index: 11, kind: input, shape index: {}]   ;;  %s4032_s12 = inlined_call_operand.vmem [shape: f32[2,128], index: 12, kind: output, shape index: {}]  }
   0x1   :  { %4040 = sst [smem:[#allocation19_spill]] %s4026_s6 }
   0x2   :  { %4041 = sst [smem:[#allocation20_spill]] %s4027_s7 }
   0x3   :  { %4042 = sst [smem:[#allocation21_spill]] %s4028_s8 }
   0x4   :  { %17 = vsyncpa [#allocation4], 0 }
   0x5   :  { %18 = vsyncpa [#allocation6], 0 }
   0x6   :  { %19 = vsyncpa [#allocation11], 0  ;;  %s3588_s21 = smov 0   ;;  %s3590_s22 = smov 0  }
   0x7   :  { %s3592_s23 = smov 0   ;;  %s3594_s24 = smov 0  }
   0x8 LB: > { %s3607_s25 = sadd.s32 4294967295, %s3511_s24   ;;  %p213_p0 = scmp.ne.s32.totalorder %s3503_s22, %s3499_s21  ;;  %s3511_s24 = sphi %s3594_s24, %s4066_s24   ;;  %s3507_s23 = sphi %s3592_s23, %s4070_s23   ;;  %s3503_s22 = sphi %s3590_s22, %s4069_s22   ;;  %s3499_s21 = sphi %s3588_s21, %s4068_s21  }
   0x9   : > { %p4033_p1 = scmp.eq.s32.totalorder %s3607_s25, 0  ;;  %p2328_p2 = scmp.ge.s32.totalorder %s3511_s24, 1 }
   0xa   : > { %p313_p3 = scmp.lt.s32.totalorder %s3511_s24, 5  ;;  %s3513_s28 = smov [#allocation3]  }
   0xb   : > { %p3616_p5 = por %p4033_p1, %p213_p0  ;;  %s344_s29 = sshll.u32 %s3513_s28, 4  ;;  %s345_s29 = int_to_ptr.vmem [resolvable:$true] %s344_s29 }
   0xc   : > { %p3620_p6 = pnand %p2328_p2, %p313_p3  ;;  %s3514_s30 = smov [#allocation5]  }
   0xd   : > { %s4043_s26 = scalar_select %p3616_p5, 1, 0 }
   0xe   : > { %s4044_s27 = scalar_select %p3620_p6, 1, 0 }
   0xf   : > { %p3168_p7 = pneg %p3620_p6  ;;  %s355_s13 = sshll.u32 %s3514_s30, 4  ;;  %s356_s13 = int_to_ptr.vmem [resolvable:$true] %s355_s13 }
  0x10   : > { %s3633_s15 = sadd.s32 1, %s3511_s24   ;;  %s3312_s17 = scalar_lea.vmem %s345_s29, 128 }
  0x11   : > { %p3628_p8 = pnand %p3168_p7, %p4033_p1  ;;  %4046 = sst [smem:[#allocation17_spill]] %s3633_s15 }
  0x12   : > { %s197_s16 = ssub.s32 %s3511_s24, %s3633_s15  ;;  %p3313_p10 = scmp.ne.s32.totalorder %s345_s29, %s3312_s17 }
  0x13   : > { %p4038_p9 = pneg %p3628_p8  ;;  %p3320_p13 = scmp.lt.s32.totalorder %s345_s29, %s345_s29 }
  0x14   : > { %p3321_p0 = scmp.lt.s32.totalorder %s3312_s17, %s3312_s17 }
  0x15   : > { %p3315_p11 = pnand %p3313_p10, %p4038_p9 }
  0x16   : > { %p3322_p2 = por %p3321_p0, %p3320_p13 }
  0x17   : > { %p3316_p12 = pneg %p3315_p11 }
  0x19   : > { %p3323_p3 = pnand %p3322_p2, %p3316_p12 }
  0x1b   : > { %3326 = shalt.err (!%p3323_p3)
}
  0x1c   : > { %s4047_s6 = sld [smem:[#allocation19_spill]]  ;;  %s3338_s20 = scalar_lea.vmem %s356_s13, 16 }
  0x1d   : > { %p3339_p7 = scmp.ne.s32.totalorder %s356_s13, %s3338_s20  ;;  %s3345_s21 = scalar_lea.vmem %s356_s13, 32 }
  0x1e   : > { %p3346_p10 = scmp.lt.s32.totalorder %s356_s13, %s356_s13  ;;  %p3347_p11 = scmp.lt.s32.totalorder %s3345_s21, %s3338_s20 }
  0x1f   : > { %p3341_p4 = pnand %p3339_p7, %p4038_p9 }
  0x20   : > { %p3348_p5 = por %p3347_p11, %p3346_p10 }
  0x21   : > { %p3342_p1 = pneg %p3341_p4 }
  0x22   : > { %3171 = dma.hbm_to_vmem [thread:$0]  (!%p3628_p8), %s4047_s6, 128, %s345_s29, [#allocation4]  }
  0x23   : > { %p3349_p13 = pnand %p3348_p5, %p3342_p1 }
  0x25   : > { %3352 = shalt.err (!%p3349_p13)
}
  0x26   : > { %s4048_s7 = sld [smem:[#allocation20_spill]]  ;;  %p198_p4 = scmp.eq.s32.totalorder %s197_s16, 0 }
  0x27   : > { %s200_s29 = sadd.s32 1, %s3507_s23  ;;  %p207_p1 = scmp.ne.s32.totalorder %s3507_s23, %s3503_s22 }
  0x28   : > { %p208_p5 = scmp.eq.s32.totalorder %s3511_s24, 0  ;;  %p3192_p0 = scmp.lt.s32.totalorder %s3511_s24, 4 }
  0x29   : > { %s3660_s17 = scalar_select %p198_p4, %s3507_s23, %s200_s29  }
  0x2a   : > { %p209_p12 = por %p208_p5, %p207_p1  ;;  %s390_s18 = sand.u32 1, %s3511_s24  }
  0x2b   : > { %4049 = sst [smem:[#allocation18_spill]] %s3660_s17  ;;  %s4035_s19 = sand.u32 1, %s3507_s23  }
  0x2c   : > { %3174 = dma.hbm_to_vmem [thread:$0]  (!%p3628_p8), %s4048_s7, 16, %s356_s13, [#allocation6]  }
  0x2d   : > { %s3146_s20 = smul.u32 896, %s4035_s19  ;;  %p3668_p2 = pnand %p3192_p0, %p209_p12 }
  0x2e   : > { %s2487_s21 = smul.u32 14336, %s3511_s24  ;;  %s4051_s8 = sld [smem:[#allocation21_spill]] }
  0x2f   : > { %s394_s16 = scalar_lea.vmem [#allocation7], %s3146_s20  ;;  %s3679_s19 = scalar_lea.sflag [#allocation4], %s390_s18 }
  0x30   : > { %s402_s29 = sshll.u32 %s394_s16, 4  ;;  %p3355_p7 = pneg %p3668_p2  ;;  %s3677_s29 = int_to_ptr.vmem [resolvable:$true] %s402_s29 }
  0x34   : > { %s3675_s13 = scalar_lea.hbm %s4051_s8, %s2487_s21  ;;  %s3358_s30 = scalar_lea.hbm %s4051_s8, 57344 }
  0x35   : > { %s3353_s7 = scalar_lea.hbm %s3675_s13, 14336  ;;  %p3359_p13 = scmp.lt.s32.totalorder %s3675_s13, %s4051_s8 }
  0x36   : > { %p3354_p3 = scmp.ne.s32.totalorder %s3675_s13, %s3353_s7  ;;  %p3360_p4 = scmp.lt.s32.totalorder %s3358_s30, %s3353_s7 }
  0x38   : > { %p3356_p10 = pnand %p3355_p7, %p3354_p3  ;;  %p3361_p1 = por %p3360_p4, %p3359_p13 }
  0x3a   : > { %p3357_p11 = pneg %p3356_p10 }
  0x3c   : > { %p3362_p5 = pnand %p3361_p1, %p3357_p11 }
  0x3e   : > { %3365 = shalt.err (!%p3362_p5)
}
  0x3f   : > { %s3366_s18 = scalar_lea.vmem %s3677_s29, 14336  ;;  %s3515_s20 = smov [#allocation7]  }
  0x40   : > { %p3367_p12 = scmp.ne.s32.totalorder %s3677_s29, %s3366_s18  ;;  %s3371_s16 = sshll.u32 %s3515_s20, 4  ;;  %s3372_s16 = int_to_ptr.vmem [resolvable:$false] %s3371_s16 }
  0x41   : > { %s3373_s6 = scalar_lea.vmem %s3372_s16, 28672  ;;  %p3374_p10 = scmp.lt.s32.totalorder %s3677_s29, %s3372_s16 }
  0x42   : > { %p3369_p0 = pnand %p3367_p12, %p3355_p7  ;;  %p3375_p9 = scmp.lt.s32.totalorder %s3373_s6, %s3366_s18 }
  0x44   : > { %p3370_p3 = pneg %p3369_p0  ;;  %p3376_p6 = por %p3375_p9, %p3374_p10 }
  0x46   : > { %p3377_p13 = pnand %p3376_p6, %p3370_p3 }
  0x48   : > { %3380 = shalt.err (!%p3377_p13)
}
  0x49   : > { %s3516_s7 = smov 128   ;;  %s3517_s15 = smov 8  }
  0x4a   : > { %3184 = dma.hbm_to_vmem [thread:$0]  (!%p3668_p2), %s3675_s13, 14336, %s3677_s29, %s3679_s19, %s3516_s7, %s3516_s7, %s3517_s15  }
  0x4b   : > { %s3518_s17 = smov [#allocation9]   ;;  %s3519_s30 = smov [#allocation10]  }
  0x4c   : > { %s365_s21 = sshll.u32 %s3518_s17, 4  ;;  %s379_s20 = sshll.u32 %s3519_s30, 4  ;;  %s366_s21 = int_to_ptr.vmem [resolvable:$true] %s365_s21  ;;  %s380_s20 = int_to_ptr.vmem [resolvable:$true] %s379_s20 }
  0x4d   : > { %s3392_s8 = scalar_lea.vmem %s366_s21, 8192  ;;  %p4052_p9 = pneg %p3628_p8 }
  0x4e   : > { %p3393_p11 = scmp.ne.s32.totalorder %s366_s21, %s3392_s8  ;;  %p3400_p1 = scmp.lt.s32.totalorder %s366_s21, %s366_s21 }
  0x4f   : > { %p3401_p5 = scmp.lt.s32.totalorder %s3392_s8, %s3392_s8 }
  0x50   : > { %p3395_p6 = pnand %p3393_p11, %p4052_p9 }
  0x51   : > { %p3402_p12 = por %p3401_p5, %p3400_p1 }
  0x52   : > { %p3396_p4 = pneg %p3395_p6 }
  0x54   : > { %p3403_p0 = pnand %p3402_p12, %p3396_p4 }
  0x56   : > { %3406 = shalt.err (!%p3403_p0)
}
  0x57   : > { %3177 = dma.hbm_to_vmem [thread:$0]  (!%p3628_p8), %s4030_s10, 8192, %s366_s21, [#allocation6], %s3516_s7, %s3516_s7, %s3517_s15  }
  0x58   : > { %s4053_s29 = sand.u32 1, %s3507_s23   ;;  %s3418_s6 = scalar_lea.vmem %s380_s20, 128 }
  0x59   : > { %s2336_s16 = sshll.u32 %s4053_s29, 3  ;;  %p3419_p3 = scmp.ne.s32.totalorder %s380_s20, %s3418_s6 }
  0x5a   : > { %p4054_p10 = pmov %p4052_p9  ;;  %p3426_p9 = scmp.lt.s32.totalorder %s380_s20, %s380_s20 }
  0x5b   : > { %p3427_p6 = scmp.lt.s32.totalorder %s3418_s6, %s3418_s6 }
  0x5c   : > { %p3421_p13 = pnand %p3419_p3, %p4054_p10 }
  0x5d   : > { %p3428_p4 = por %p3427_p6, %p3426_p9 }
  0x5e   : > { %p3422_p11 = pneg %p3421_p13 }
  0x60   : > { %p3429_p1 = pnand %p3428_p4, %p3422_p11 }
  0x62   : > { %3432 = shalt.err (!%p3429_p1)
}
  0x63   : > { %3180 = dma.hbm_to_vmem [thread:$0]  (!%p3628_p8), %s4031_s11, 128, %s380_s20, [#allocation11]  }
  0x64   : > { %s2337_s7 = sshll.u32 %s3511_s24, 7  ;;  %s416_s18 = scalar_lea.vmem [#allocation8], %s2336_s16 }
  0x65   : > { %s421_s30 = scalar_lea.hbm %s4029_s9, %s2337_s7  ;;  %s423_s13 = sshll.u32 %s416_s18, 4  ;;  %s424_s13 = int_to_ptr.vmem [resolvable:$true] %s423_s13 }
  0x66   : > { %s3433_s29 = scalar_lea.hbm %s421_s30, 128  ;;  %s3438_s8 = scalar_lea.hbm %s4029_s9, 512 }
  0x67   : > { %p3434_p5 = scmp.ne.s32.totalorder %s421_s30, %s3433_s29  ;;  %p3439_p8 = scmp.lt.s32.totalorder %s421_s30, %s4029_s9 }
  0x68   : > { %p3440_p3 = scmp.lt.s32.totalorder %s3438_s8, %s3433_s29 }
  0x69   : > { %p3436_p12 = pnand %p3434_p5, %p3355_p7 }
  0x6a   : > { %p3441_p10 = por %p3440_p3, %p3439_p8 }
  0x6b   : > { %p3437_p0 = pneg %p3436_p12 }
  0x6d   : > { %p3442_p13 = pnand %p3441_p10, %p3437_p0 }
  0x6f   : > { %3445 = shalt.err (!%p3442_p13)
}
  0x70   : > { %s3446_s24 = scalar_lea.vmem %s424_s13, 128  ;;  %s3520_s16 = smov [#allocation8]  }
  0x71   : > { %p3447_p11 = scmp.ne.s32.totalorder %s424_s13, %s3446_s24  ;;  %s3451_s7 = sshll.u32 %s3520_s16, 4  ;;  %s3452_s7 = int_to_ptr.vmem [resolvable:$false] %s3451_s7 }
  0x72   : > { %s3453_s15 = scalar_lea.vmem %s3452_s7, 256  ;;  %p3454_p4 = scmp.lt.s32.totalorder %s424_s13, %s3452_s7 }
  0x73   : > { %p3449_p9 = pnand %p3447_p11, %p3355_p7  ;;  %p3455_p1 = scmp.lt.s32.totalorder %s3453_s15, %s3446_s24 }
  0x75   : > { %p3450_p6 = pneg %p3449_p9  ;;  %p3456_p5 = por %p3455_p1, %p3454_p4 }
  0x77   : > { %p3457_p12 = pnand %p3456_p5, %p3450_p6 }
  0x79   : > { %3460 = shalt.err (!%p3457_p12)
}
  0x7a   : > { %3187 = dma.hbm_to_vmem [thread:$0]  (!%p3668_p2), %s421_s30, 128, %s424_s13, %s3679_s19  }
  0x7b   : > { %p4055_p0 = scmp.ne.s32.totalorder %s4044_s27, 0 }
  0x7c   : > { %p4056_p8 = scmp.eq.s32.totalorder (!%p4055_p0), %s3607_s25, 0 }
  0x7d   : > { %432 = sbr.rel (%p4055_p0) target bundleno = 2958 (0xb8e), region = 68 }
  0x82   : > { %3478 = dma.done.wait (%p4056_p8), [#allocation4], 128   ;;  %p4057_p7 = pmov %p4056_p8 }
  0x84   : > { %3480 = vsyncadd (%p4057_p7), [#allocation4], 4294967168  ;;  %p4058_p3 = pmov %p4057_p7 }
  0x86   : > { %3482 = dma.done.wait (%p4058_p3), [#allocation6], 16   ;;  %p4059_p10 = pmov %p4058_p3 }
  0x87   : > { %s442_s28 = sand.u32 1, %s3607_s25   ;;  %s444_s19 = sand.u32 1, %s3503_s22  }
  0x88   : > { %3484 = vsyncadd (%p4059_p10), [#allocation6], 4294967280  ;;  %s3147_s21 = smul.u32 896, %s444_s19  ;;  %s443_s27 = scalar_lea.sflag [#allocation4], %s442_s28 }
  0x89   : > { %p4060_p2 = scmp.ne.s32.totalorder %s4043_s26, 0 }
  0x8a   : > { %s3755_s30 = scalar_lea.vmem [#allocation7], %s3147_s21 }
  0x8b   : > { %3486 = dma.done.wait (%p4060_p2), %s443_s27, 14464  }
  0x8c   : > { %3488 = vsyncadd (%p4060_p2), %s443_s27, 4294952832  ;;  %s2341_s18 = sshll.u32 %s444_s19, 3  ;;  %p4061_p13 = pmov %p4058_p3 }
  0x8d   : > { %s3761_s13 = scalar_lea.vmem [#allocation8], %s2341_s18 }
  0x8e   : > { %3490 = dma.done.wait (%p4061_p13), [#allocation6], 8192   ;;  %p4062_p11 = pmov %p4058_p3 }
  0x8f   : > { %p4063_p9 = pmov %p4058_p3 }
  0x90   : > { %3492 = vsyncadd (%p4062_p11), [#allocation6], 4294959104 }
  0x91   : > { %3494 = dma.done.wait (%p4063_p9), [#allocation11], 128   ;;  %p4064_p6 = pmov %p4058_p3 }
  0x92   : > { %p4065_p4 = scmp.ne.s32.totalorder %s3607_s25, 0 }
  0x93   : > { %3496 = vsyncadd (%p4064_p6), [#allocation11], 4294967168 }
  0x94   : > { %508 = sbr.rel (%p4065_p4) target bundleno = 388 (0x184), region = 96 }
  0x99   : > { %v511_v0 = vld [vmem:[#allocation3] sm:$0xff]  ;;  %v509_v1 = vld [vmem:[%s4020_s0] sm:$0xff]  ;;  %vm519_vm0 = vcmask 64512   ;;  %v510_v2 = vld [vmem:[%s4020_s0 + $0x8] sm:$0xff] }
  0x9a   : > { %2712 = vmatprep.subr.mxu0 %v511_v0  ;;  %2714 = vmatprep.mubr.msk.f32.mxu0 %vm519_vm0, %v509_v1  ;;  %v2345_v3 = vld [vmem:[#allocation5] ss:$0 sm:$0xff] }
  0x9b   : > { %2713 = vmatpush3.msra.mxu0 %v511_v0 }
  0x9c   : > { %2715 = vmatmul.mubr.msk.f32.vlgmr.msra.gmra.mxu0 %vm519_vm0, %v510_v2 }
 0x15c   : > { %v2716_v4 = vpop.f32.mrf.mxu0 }
 0x15d   : > { %v598_v5 = vadd.f32 %v2716_v4, %v2345_v3 }
 0x15e   : > { %v592_v6 = vpop.f32.mrf.mxu0 }
 0x15f   : > { %v2349_v7 = vmul.f32 -1.442695, %v598_v5  ;;  %v593_v8 = vadd.f32 %v2345_v3, %v592_v6 }
 0x161   : > { %3237 = vpow2.f32 %v2349_v7  ;;  %v2348_v9 = vmul.f32 -1.442695, %v593_v8 }
 0x163   : > { %3239 = vpow2.f32 %v2348_v9 }
 0x16e   : > { %v3238_v10 = vpop.eup %3237 }
 0x16f   : > { %v608_v11 = vadd.f32 1.0, %v3238_v10 }
 0x170   : > { %v3240_v12 = vpop.eup %3239 }
 0x171   : > { %3241 = vrcp.f32 %v608_v11  ;;  %v607_v13 = vadd.f32 1.0, %v3240_v12 }
 0x173   : > { %3243 = vrcp.f32 %v607_v13 }
 0x17e   : > { %v3242_v14 = vpop.eup %3241 }
 0x17f   : > { %v614_v15 = vmul.f32 %v3242_v14, %v598_v5 }
 0x180   : > { %v3244_v16 = vpop.eup %3243 }
 0x181   : > { %616 = vst [vmem:[#allocation2 + $0x8] sm:$0xff] %v614_v15  ;;  %v613_v17 = vmul.f32 %v3244_v16, %v593_v8 }
 0x183   : > { %615 = vst [vmem:[#allocation2] sm:$0xff] %v613_v17 }
 0x184 PF: > { %v2365_v18 = vld [vmem:[%s3755_s30 + $0xf8] sm:$0xff]  ;;  %v2364_v20 = vld [vmem:[%s3755_s30 + $0xf0] sm:$0xff]  ;;  %v2363_v22 = vld [vmem:[%s3755_s30 + $0xe8] sm:$0xff]  ;;  %vm810_vm1 = vcmask 130048   ;;  %vm1289_vm2 = vcmask 261120   ;;  %p2470_p1 = scmp.ne.s32.totalorder %s3607_s25, 3 }
 0x185   : > { %v634_v19 = vld [vmem:[%s3755_s30 + $0x78] sm:$0xff]  ;;  %2752 = vmatprep.subr.mxu1 %v2365_v18  ;;  %v633_v21 = vld [vmem:[%s3755_s30 + $0x70] sm:$0xff]  ;;  %v632_v23 = vld [vmem:[%s3755_s30 + $0x68] sm:$0xff] }
 0x186   : > { %2717 = vmatprep.subr.mxu0 %v634_v19  ;;  %2753 = vmatpush3.msra.mxu1 %v2365_v18  ;;  %v2362_v24 = vld [vmem:[%s3755_s30 + $0xe0] sm:$0xff]  ;;  %v2361_v26 = vld [vmem:[%s3755_s30 + $0xd8] sm:$0xff]  ;;  %v2360_v28 = vld [vmem:[%s3755_s30 + $0xd0] sm:$0xff] }
 0x187   : > { %2718 = vmatpush3.msra.mxu0 %v634_v19  ;;  %2754 = vmatprep.subr.mxu1 %v2364_v20  ;;  %v631_v25 = vld [vmem:[%s3755_s30 + $0x60] sm:$0xff]  ;;  %v630_v27 = vld [vmem:[%s3755_s30 + $0x58] sm:$0xff]  ;;  %v629_v29 = vld [vmem:[%s3755_s30 + $0x50] sm:$0xff] }
 0x188   : > { %2719 = vmatprep.subr.mxu0 %v633_v21  ;;  %2755 = vmatpush3.msra.mxu1 %v2364_v20  ;;  %v2359_v30 = vld [vmem:[%s3755_s30 + $0xc8] sm:$0xff]  ;;  %v2358_v32 = vld [vmem:[%s3755_s30 + $0xc0] sm:$0xff]  ;;  %v2357_v34 = vld [vmem:[%s3755_s30 + $0xb8] sm:$0xff] }
 0x189   : > { %2720 = vmatpush3.msra.mxu0 %v633_v21  ;;  %2756 = vmatprep.subr.mxu1 %v2363_v22  ;;  %v628_v31 = vld [vmem:[%s3755_s30 + $0x48] sm:$0xff]  ;;  %v627_v33 = vld [vmem:[%s3755_s30 + $0x40] sm:$0xff]  ;;  %v626_v35 = vld [vmem:[%s3755_s30 + $0x38] sm:$0xff] }
 0x18a   : > { %2721 = vmatprep.subr.mxu0 %v632_v23  ;;  %2757 = vmatpush3.msra.mxu1 %v2363_v22  ;;  %v2356_v36 = vld [vmem:[%s3755_s30 + $0xb0] sm:$0xff]  ;;  %v2355_v38 = vld [vmem:[%s3755_s30 + $0xa8] sm:$0xff]  ;;  %v2354_v40 = vld [vmem:[%s3755_s30 + $0xa0] sm:$0xff] }
 0x18b   : > { %2722 = vmatpush3.msra.mxu0 %v632_v23  ;;  %2758 = vmatprep.subr.mxu1 %v2362_v24  ;;  %v625_v37 = vld [vmem:[%s3755_s30 + $0x30] sm:$0xff]  ;;  %v624_v39 = vld [vmem:[%s3755_s30 + $0x28] sm:$0xff]  ;;  %v623_v41 = vld [vmem:[%s3755_s30 + $0x20] sm:$0xff] }
 0x18c   : > { %2723 = vmatprep.subr.mxu0 %v631_v25  ;;  %2759 = vmatpush3.msra.mxu1 %v2362_v24  ;;  %v2353_v42 = vld [vmem:[%s3755_s30 + $0x98] sm:$0xff]  ;;  %v2352_v44 = vld [vmem:[%s3755_s30 + $0x90] sm:$0xff]  ;;  %v2351_v46 = vld [vmem:[%s3755_s30 + $0x88] sm:$0xff] }
 0x18d   : > { %2724 = vmatpush3.msra.mxu0 %v631_v25  ;;  %2760 = vmatprep.subr.mxu1 %v2361_v26  ;;  %v622_v43 = vld [vmem:[%s3755_s30 + $0x18] sm:$0xff]  ;;  %v621_v45 = vld [vmem:[%s3755_s30 + $0x10] sm:$0xff]  ;;  %v620_v47 = vld [vmem:[%s3755_s30 + $0x8] sm:$0xff] }
 0x18e   : > { %2725 = vmatprep.subr.mxu0 %v630_v27  ;;  %2761 = vmatpush3.msra.mxu1 %v2361_v26  ;;  %v2350_v48 = vld [vmem:[%s3755_s30 + $0x80] sm:$0xff]  ;;  %v3813_v51 = vld [vmem:[#allocation2 + $0x8] sm:$0xff]  ;;  %v808_v57 = vld [vmem:[%s4022_s2 + $0x10] sm:$0xff] }
 0x18f   : > { %2726 = vmatpush3.msra.mxu0 %v630_v27  ;;  %2762 = vmatprep.subr.mxu1 %v2360_v28  ;;  %v3810_v49 = vld [vmem:[#allocation2] sm:$0xff]  ;;  %v807_v56 = vld [vmem:[%s4022_s2 + $0x8] sm:$0xff]  ;;  %v809_v59 = vld [vmem:[%s4022_s2 + $0x18] sm:$0xff] }
 0x190   : > { %2727 = vmatprep.subr.mxu0 %v629_v29  ;;  %2763 = vmatpush3.msra.mxu1 %v2360_v28  ;;  %v619_v50 = vld [vmem:[%s3755_s30] sm:$0xff]  ;;  %v2389_v60 = vld [vmem:[%s3755_s30 + $0x178] sm:$0xff]  ;;  %v803_v62 = vld [vmem:[%s4023_s3 + $0x8] sm:$0xff] }
 0x191   : > { %2728 = vmatpush3.msra.mxu0 %v629_v29  ;;  %2764 = vmatprep.subr.mxu1 %v2359_v30  ;;  %v806_v52 = vld [vmem:[%s4022_s2] sm:$0xff]  ;;  %v804_v63 = vld [vmem:[%s4023_s3 + $0x10] sm:$0xff]  ;;  %v805_v2 = vld [vmem:[%s4023_s3 + $0x18] sm:$0xff] }
 0x192   : > { %2729 = vmatprep.subr.mxu0 %v628_v31  ;;  %2765 = vmatpush3.msra.mxu1 %v2359_v30  ;;  %v802_v61 = vld [vmem:[%s4023_s3] sm:$0xff]  ;;  %v2388_v0 = vld [vmem:[%s3755_s30 + $0x170] sm:$0xff]  ;;  %v2385_v5 = vld [vmem:[%s3755_s30 + $0x158] sm:$0xff] }
 0x193   : > { %2730 = vmatpush3.msra.mxu0 %v628_v31  ;;  %2766 = vmatprep.subr.mxu1 %v2358_v32  ;;  %v2387_v1 = vld [vmem:[%s3755_s30 + $0x168] sm:$0xff]  ;;  %v2386_v4 = vld [vmem:[%s3755_s30 + $0x160] sm:$0xff]  ;;  %v2384_v6 = vld [vmem:[%s3755_s30 + $0x150] sm:$0xff] }
 0x194   : > { %2731 = vmatprep.subr.mxu0 %v627_v33  ;;  %2767 = vmatpush3.msra.mxu1 %v2358_v32  ;;  %v1005_v3 = vld [vmem:[%s4021_s1] sm:$0xff]  ;;  %v2381_v9 = vld [vmem:[%s3755_s30 + $0x138] sm:$0xff]  ;;  %v2380_v10 = vld [vmem:[%s3755_s30 + $0x130] sm:$0xff] }
 0x195   : > { %2732 = vmatpush3.msra.mxu0 %v627_v33  ;;  %2768 = vmatprep.subr.mxu1 %v2357_v34  ;;  %v2383_v7 = vld [vmem:[%s3755_s30 + $0x148] sm:$0xff]  ;;  %v2382_v8 = vld [vmem:[%s3755_s30 + $0x140] sm:$0xff]  ;;  %v2377_v13 = vld [vmem:[%s3755_s30 + $0x118] sm:$0xff] }
 0x196   : > { %2733 = vmatprep.subr.mxu0 %v626_v35  ;;  %2769 = vmatpush3.msra.mxu1 %v2357_v34  ;;  %v2379_v11 = vld [vmem:[%s3755_s30 + $0x128] sm:$0xff]  ;;  %v2378_v12 = vld [vmem:[%s3755_s30 + $0x120] sm:$0xff]  ;;  %v2376_v14 = vld [vmem:[%s3755_s30 + $0x110] sm:$0xff] }
 0x197   : > { %2734 = vmatpush3.msra.mxu0 %v626_v35  ;;  %2770 = vmatprep.subr.mxu1 %v2356_v36  ;;  %v2375_v15 = vld [vmem:[%s3755_s30 + $0x108] sm:$0xff]  ;;  %v2374_v16 = vld [vmem:[%s3755_s30 + $0x100] sm:$0xff]  ;;  %v1007_v18 = vld [vmem:[%s4021_s1 + $0x10] sm:$0xff] }
 0x198   : > { %2735 = vmatprep.subr.mxu0 %v625_v37  ;;  %2771 = vmatpush3.msra.mxu1 %v2356_v36  ;;  %v1006_v17 = vld [vmem:[%s4021_s1 + $0x8] sm:$0xff]  ;;  %v1008_v19 = vld [vmem:[%s4021_s1 + $0x18] sm:$0xff] }
 0x199   : > { %2736 = vmatpush3.msra.mxu0 %v625_v37  ;;  %2772 = vmatprep.subr.mxu1 %v2355_v38  ;;  %v2410_v20 = vld [vmem:[%s3755_s30 + $0x1f8] sm:$0xff]  ;;  %v2409_v21 = vld [vmem:[%s3755_s30 + $0x1f0] sm:$0xff]  ;;  %v2408_v22 = vld [vmem:[%s3755_s30 + $0x1e8] sm:$0xff] }
 0x19a   : > { %2737 = vmatprep.subr.mxu0 %v624_v39  ;;  %2773 = vmatpush3.msra.mxu1 %v2355_v38  ;;  %v2407_v23 = vld [vmem:[%s3755_s30 + $0x1e0] sm:$0xff]  ;;  %v2406_v24 = vld [vmem:[%s3755_s30 + $0x1d8] sm:$0xff]  ;;  %v2405_v25 = vld [vmem:[%s3755_s30 + $0x1d0] sm:$0xff] }
 0x19b   : > { %2738 = vmatpush3.msra.mxu0 %v624_v39  ;;  %2774 = vmatprep.subr.mxu1 %v2354_v40  ;;  %v2404_v26 = vld [vmem:[%s3755_s30 + $0x1c8] sm:$0xff]  ;;  %v2403_v27 = vld [vmem:[%s3755_s30 + $0x1c0] sm:$0xff]  ;;  %v2402_v28 = vld [vmem:[%s3755_s30 + $0x1b8] sm:$0xff] }
 0x19c   : > { %2739 = vmatprep.subr.mxu0 %v623_v41  ;;  %2775 = vmatpush3.msra.mxu1 %v2354_v40  ;;  %v2401_v29 = vld [vmem:[%s3755_s30 + $0x1b0] sm:$0xff]  ;;  %v2400_v30 = vld [vmem:[%s3755_s30 + $0x1a8] sm:$0xff]  ;;  %v2399_v31 = vld [vmem:[%s3755_s30 + $0x1a0] sm:$0xff] }
 0x19d   : > { %2740 = vmatpush3.msra.mxu0 %v623_v41  ;;  %2776 = vmatprep.subr.mxu1 %v2353_v42  ;;  %v2398_v32 = vld [vmem:[%s3755_s30 + $0x198] sm:$0xff]  ;;  %v2397_v33 = vld [vmem:[%s3755_s30 + $0x190] sm:$0xff]  ;;  %v2396_v34 = vld [vmem:[%s3755_s30 + $0x188] sm:$0xff] }
 0x19e   : > { %2741 = vmatprep.subr.mxu0 %v622_v43  ;;  %2777 = vmatpush3.msra.mxu1 %v2353_v42  ;;  %v2395_v35 = vld [vmem:[%s3755_s30 + $0x180] sm:$0xff] }
 0x19f   : > { %2742 = vmatpush3.msra.mxu0 %v622_v43  ;;  %2778 = vmatprep.subr.mxu1 %v2352_v44 }
 0x1a0   : > { %2743 = vmatprep.subr.mxu0 %v621_v45  ;;  %2779 = vmatpush3.msra.mxu1 %v2352_v44 }
 0x1a1   : > { %2744 = vmatpush3.msra.mxu0 %v621_v45  ;;  %2780 = vmatprep.subr.mxu1 %v2351_v46 }
 0x1a2   : > { %2745 = vmatprep.subr.mxu0 %v620_v47  ;;  %2781 = vmatpush3.msra.mxu1 %v2351_v46  ;;  %v2390_v46 = vld [vmem:[%s3761_s13] ss:$0 sm:$0xff] }
 0x1a3   : > { %2746 = vmatpush3.msra.mxu0 %v620_v47  ;;  %2782 = vmatprep.subr.mxu1 %v2350_v48 }
 0x1a4   : > { %2784 = vmatprep.mubr.f32.mxu1 %v3810_v49  ;;  %2783 = vmatpush3.msra.mxu1 %v2350_v48 }
 0x1a5   : > { %2747 = vmatprep.subr.mxu0 %v619_v50  ;;  %2785 = vmatmul.mubr.f32.vlgmr.msra.gmra.mxu1 %v3813_v51 }
 0x1a6   : > { %2748 = vmatpush3.msra.mxu0 %v619_v50  ;;  %2749 = vmatprep.mubr.f32.mxu0 %v3810_v49 }
 0x1a7   : > { %2750 = vmatmul.mubr.f32.vlgmr.msra.gmra.mxu0 %v3813_v51  ;;  %2845 = vmatprep.subr.mxu1 %v2410_v20 }
 0x1a8   : > { %2791 = vmatprep.mubr.msk.f32.mxu0 %vm810_vm1, %v806_v52  ;;  %2846 = vmatpush3.msra.mxu1 %v2410_v20  ;;  %v2449_v20 = vld [vmem:[%s3755_s30 + $0x2f8] sm:$0xff] }
 0x1a9   : > { %2847 = vmatprep.subr.mxu1 %v2409_v21 }
 0x1aa   : > { %2848 = vmatpush3.msra.mxu1 %v2409_v21  ;;  %v2448_v21 = vld [vmem:[%s3755_s30 + $0x2f0] sm:$0xff] }
 0x1ab   : > { %2849 = vmatprep.subr.mxu1 %v2408_v22 }
 0x1ac   : > { %2850 = vmatpush3.msra.mxu1 %v2408_v22  ;;  %v2447_v22 = vld [vmem:[%s3755_s30 + $0x2e8] sm:$0xff] }
 0x1ad   : > { %2851 = vmatprep.subr.mxu1 %v2407_v23 }
 0x1ae   : > { %2852 = vmatpush3.msra.mxu1 %v2407_v23  ;;  %v2446_v23 = vld [vmem:[%s3755_s30 + $0x2e0] sm:$0xff] }
 0x1af   : > { %2853 = vmatprep.subr.mxu1 %v2406_v24 }
 0x1b0   : > { %2854 = vmatpush3.msra.mxu1 %v2406_v24  ;;  %v2445_v24 = vld [vmem:[%s3755_s30 + $0x2d8] sm:$0xff] }
 0x1b1   : > { %2855 = vmatprep.subr.mxu1 %v2405_v25 }
 0x1b2   : > { %2856 = vmatpush3.msra.mxu1 %v2405_v25  ;;  %v2444_v25 = vld [vmem:[%s3755_s30 + $0x2d0] sm:$0xff] }
 0x1b3   : > { %2857 = vmatprep.subr.mxu1 %v2404_v26 }
 0x1b4   : > { %2858 = vmatpush3.msra.mxu1 %v2404_v26  ;;  %v2443_v26 = vld [vmem:[%s3755_s30 + $0x2c8] sm:$0xff] }
 0x1b5   : > { %2859 = vmatprep.subr.mxu1 %v2403_v27 }
 0x1b6   : > { %2860 = vmatpush3.msra.mxu1 %v2403_v27  ;;  %v2442_v27 = vld [vmem:[%s3755_s30 + $0x2c0] sm:$0xff] }
 0x1b7   : > { %2861 = vmatprep.subr.mxu1 %v2402_v28 }
 0x1b8   : > { %2862 = vmatpush3.msra.mxu1 %v2402_v28  ;;  %v2441_v28 = vld [vmem:[%s3755_s30 + $0x2b8] sm:$0xff] }
 0x1b9   : > { %2863 = vmatprep.subr.mxu1 %v2401_v29 }
 0x1ba   : > { %2864 = vmatpush3.msra.mxu1 %v2401_v29  ;;  %v2440_v29 = vld [vmem:[%s3755_s30 + $0x2b0] sm:$0xff] }
 0x1bb   : > { %2865 = vmatprep.subr.mxu1 %v2400_v30 }
 0x1bc   : > { %2866 = vmatpush3.msra.mxu1 %v2400_v30  ;;  %v2439_v30 = vld [vmem:[%s3755_s30 + $0x2a8] sm:$0xff] }
 0x1bd   : > { %2867 = vmatprep.subr.mxu1 %v2399_v31 }
 0x1be   : > { %2868 = vmatpush3.msra.mxu1 %v2399_v31  ;;  %v2438_v31 = vld [vmem:[%s3755_s30 + $0x2a0] sm:$0xff] }
 0x1bf   : > { %2869 = vmatprep.subr.mxu1 %v2398_v32 }
 0x1c0   : > { %2870 = vmatpush3.msra.mxu1 %v2398_v32  ;;  %v2437_v32 = vld [vmem:[%s3755_s30 + $0x298] sm:$0xff] }
 0x1c1   : > { %2871 = vmatprep.subr.mxu1 %v2397_v33 }
 0x1c2   : > { %2872 = vmatpush3.msra.mxu1 %v2397_v33  ;;  %v2436_v33 = vld [vmem:[%s3755_s30 + $0x290] sm:$0xff] }
 0x1c3   : > { %2873 = vmatprep.subr.mxu1 %v2396_v34 }
 0x1c4   : > { %2874 = vmatpush3.msra.mxu1 %v2396_v34  ;;  %v2411_v34 = vld [vmem:[%s3761_s13 + $0x1] ss:$0 sm:$0xff] }
 0x1c5   : > { %2875 = vmatprep.subr.mxu1 %v2395_v35 }
 0x1c6   : > { %2876 = vmatpush3.msra.mxu1 %v2395_v35 }
 0x1c7   : > { %2894 = vmatprep.subr.mxu1 %v2449_v20 }
 0x265   : > { %v2786_v53 = vpop.f32.mrf.mxu1 }
 0x266   : > { %2787 = vmatprep.subr.mxu0 %v2786_v53 }
 0x267   : > { %v2751_v54 = vpop.f32.mrf.mxu0  ;;  %v793_v55 = vpop.f32.mrf.mxu1  ;;  %2788 = vmatpush3.msra.mxu0 %v2786_v53 }
 0x268   : > { %2789 = vmatprep.subr.mxu0 %v793_v55 }
 0x269   : > { %v701_v58 = vpop.f32.mrf.mxu0  ;;  %2790 = vmatpush3.msra.mxu0 %v793_v55 }
 0x26a   : > { %2792 = vmatmul.mubr.msk.f32.vlgmr.msra.gmra.mxu0 %vm810_vm1, %v807_v56  ;;  %2797 = vmatprep.subr.mxu0 %v2751_v54 }
 0x26b   : > { %2798 = vmatpush3.msra.mxu0 %v2751_v54  ;;  %2794 = vmatprep.mubr.msk.f32.mxu0 %vm810_vm1, %v808_v57 }
 0x26c   : > { %2799 = vmatprep.subr.mxu0 %v701_v58 }
 0x26d   : > { %2800 = vmatpush3.msra.mxu0 %v701_v58 }
 0x26e   : > { %2795 = vmatmul.mubr.msk.f32.gmra.mxu0 %vm810_vm1, %v809_v59  ;;  %2807 = vmatprep.subr.mxu0 %v2389_v60 }
 0x26f   : > { %2801 = vmatprep.mubr.msk.f32.mxu0 %vm810_vm1, %v802_v61 }
 0x272   : > { %2802 = vmatmul.mubr.msk.f32.vlgmr.msra.gmra.mxu0 %vm810_vm1, %v803_v62 }
 0x273   : > { %2808 = vmatpush3.msra.mxu0 %v2389_v60  ;;  %2804 = vmatprep.mubr.msk.f32.mxu0 %vm810_vm1, %v804_v63 }
 0x274   : > { %2809 = vmatprep.subr.mxu0 %v2388_v0 }
 0x275   : > { %2810 = vmatpush3.msra.mxu0 %v2388_v0 }
 0x276   : > { %2811 = vmatprep.subr.mxu0 %v2387_v1  ;;  %2805 = vmatmul.mubr.msk.f32.gmra.mxu0 %vm810_vm1, %v805_v2 }
 0x277   : > { %2812 = vmatpush3.msra.mxu0 %v2387_v1  ;;  %2839 = vmatprep.mubr.f32.mxu0 %v1005_v3 }
 0x278   : > { %2813 = vmatprep.subr.mxu0 %v2386_v4 }
 0x279   : > { %2814 = vmatpush3.msra.mxu0 %v2386_v4 }
 0x27a   : > { %2815 = vmatprep.subr.mxu0 %v2385_v5 }
 0x27b   : > { %2816 = vmatpush3.msra.mxu0 %v2385_v5 }
 0x27c   : > { %2817 = vmatprep.subr.mxu0 %v2384_v6 }
 0x27d   : > { %2818 = vmatpush3.msra.mxu0 %v2384_v6 }
 0x27e   : > { %2819 = vmatprep.subr.mxu0 %v2383_v7 }
 0x27f   : > { %2820 = vmatpush3.msra.mxu0 %v2383_v7 }
 0x280   : > { %2821 = vmatprep.subr.mxu0 %v2382_v8 }
 0x281   : > { %2822 = vmatpush3.msra.mxu0 %v2382_v8 }
 0x282   : > { %2823 = vmatprep.subr.mxu0 %v2381_v9 }
 0x283   : > { %2824 = vmatpush3.msra.mxu0 %v2381_v9 }
 0x284   : > { %2825 = vmatprep.subr.mxu0 %v2380_v10 }
 0x285   : > { %2826 = vmatpush3.msra.mxu0 %v2380_v10 }
 0x286   : > { %2827 = vmatprep.subr.mxu0 %v2379_v11 }
 0x287   : > { %2828 = vmatpush3.msra.mxu0 %v2379_v11 }
 0x288   : > { %2829 = vmatprep.subr.mxu0 %v2378_v12 }
 0x289   : > { %2830 = vmatpush3.msra.mxu0 %v2378_v12 }
 0x28a   : > { %2831 = vmatprep.subr.mxu0 %v2377_v13 }
 0x28b   : > { %2832 = vmatpush3.msra.mxu0 %v2377_v13 }
 0x28c   : > { %2833 = vmatprep.subr.mxu0 %v2376_v14 }
 0x28d   : > { %2834 = vmatpush3.msra.mxu0 %v2376_v14 }
 0x28e   : > { %2835 = vmatprep.subr.mxu0 %v2375_v15 }
 0x28f   : > { %2836 = vmatpush3.msra.mxu0 %v2375_v15 }
 0x290   : > { %2837 = vmatprep.subr.mxu0 %v2374_v16 }
 0x291   : > { %2838 = vmatpush3.msra.mxu0 %v2374_v16 }
 0x292   : > { %2840 = vmatmul.mubr.f32.vlgmr.msra.gmra.mxu0 %v1006_v17 }
 0x293   : > { %2842 = vmatprep.mubr.f32.mxu0 %v1007_v18 }
 0x296   : > { %2843 = vmatmul.mubr.f32.gmra.mxu0 %v1008_v19  ;;  %v1287_v19 = vld [vmem:[%s4024_s4] sm:$0xff] }
 0x297   : > { %2891 = vmatprep.mubr.msk.f32.mxu0 %vm1289_vm2, %v1287_v19  ;;  %v2434_v19 = vld [vmem:[%s3755_s30 + $0x280] sm:$0xff] }
 0x32a   : > { %v2793_v36 = vpop.f32.mrf.mxu0 }
 0x32c   : > { %v889_v37 = vpop.f32.mrf.mxu0 }
 0x32e   : > { %v2796_v38 = vpop.f32.mrf.mxu0 }
 0x330   : > { %v899_v39 = vpop.f32.mrf.mxu0 }
 0x332   : > { %v2803_v40 = vpop.f32.mrf.mxu0 }
 0x333   : > { %v992_v44 = vadd.f32 %v2803_v40, %v2793_v36 }
 0x334   : > { %v986_v41 = vpop.f32.mrf.mxu0 }
 0x335   : > { %v987_v47 = vadd.f32 %v986_v41, %v889_v37 }
 0x336   : > { %v2806_v42 = vpop.f32.mrf.mxu0 }
 0x337   : > { %v1002_v52 = vadd.f32 %v2806_v42, %v2796_v38 }
 0x338   : > { %v996_v43 = vpop.f32.mrf.mxu0 }
 0x339   : > { %v997_v56 = vadd.f32 %v996_v43, %v899_v39 }
 0x352   : > { %v2841_v45 = vpop.f32.mrf.mxu0 }
 0x353   : > { %v1112_v48 = vadd.f32 %v2841_v45, %v992_v44 }
 0x354   : > { %v1092_v50 = vpop.f32.mrf.mxu0 }
 0x355   : > { %v1121_v53 = vadd.f32 %v2390_v46, %v1112_v48  ;;  %v1111_v54 = vadd.f32 %v1092_v50, %v987_v47 }
 0x356   : > { %v2844_v55 = vpop.f32.mrf.mxu0 }
 0x357   : > { %v2392_v57 = vmul.f32 -1.442695, %v1121_v53  ;;  %v1120_v58 = vadd.f32 %v2390_v46, %v1111_v54  ;;  %v1114_v59 = vadd.f32 %v2844_v55, %v1002_v52 }
 0x358   : > { %v1102_v60 = vpop.f32.mrf.mxu0 }
 0x359   : > { %3245 = vpow2.f32 %v2392_v57  ;;  %v2391_v61 = vmul.f32 -1.442695, %v1120_v58  ;;  %v1123_v62 = vadd.f32 %v2390_v46, %v1114_v59  ;;  %v1113_v63 = vadd.f32 %v1102_v60, %v997_v56 }
 0x35b   : > { %3247 = vpow2.f32 %v2391_v61  ;;  %v2394_v0 = vmul.f32 -1.442695, %v1123_v62  ;;  %v1122_v1 = vadd.f32 %v2390_v46, %v1113_v63 }
 0x35d   : > { %3249 = vpow2.f32 %v2394_v0  ;;  %v2393_v2 = vmul.f32 -1.442695, %v1122_v1 }
 0x35f   : > { %3251 = vpow2.f32 %v2393_v2  ;;  %v2433_v2 = vld [vmem:[%s3755_s30 + $0x278] sm:$0xff] }
 0x366   : > { %v3246_v3 = vpop.eup %3245 }
 0x367   : > { %v1137_v4 = vadd.f32 1.0, %v3246_v3  ;;  %v2432_v3 = vld [vmem:[%s3755_s30 + $0x270] sm:$0xff] }
 0x368   : > { %v3248_v5 = vpop.eup %3247 }
 0x369   : > { %v1136_v6 = vadd.f32 1.0, %v3248_v5  ;;  %3253 = vrcp.f32 %v1137_v4  ;;  %v2431_v4 = vld [vmem:[%s3755_s30 + $0x268] sm:$0xff]  ;;  %v2430_v5 = vld [vmem:[%s3755_s30 + $0x260] sm:$0xff] }
 0x36a   : > { %v3250_v7 = vpop.eup %3249 }
 0x36b   : > { %3255 = vrcp.f32 %v1136_v6  ;;  %v1139_v8 = vadd.f32 1.0, %v3250_v7  ;;  %v2429_v6 = vld [vmem:[%s3755_s30 + $0x258] sm:$0xff]  ;;  %v2428_v7 = vld [vmem:[%s3755_s30 + $0x250] sm:$0xff] }
 0x36c   : > { %v3252_v9 = vpop.eup %3251 }
 0x36d   : > { %v1138_v10 = vadd.f32 1.0, %v3252_v9  ;;  %3257 = vrcp.f32 %v1139_v8  ;;  %v2427_v8 = vld [vmem:[%s3755_s30 + $0x248] sm:$0xff]  ;;  %v2426_v9 = vld [vmem:[%s3755_s30 + $0x240] sm:$0xff] }
 0x36f   : > { %3259 = vrcp.f32 %v1138_v10  ;;  %v2425_v10 = vld [vmem:[%s3755_s30 + $0x238] sm:$0xff] }
 0x376   : > { %v3254_v11 = vpop.eup %3253 }
 0x377   : > { %v1149_v14 = vmul.f32 %v3254_v11, %v1121_v53  ;;  %v2424_v11 = vld [vmem:[%s3755_s30 + $0x230] sm:$0xff] }
 0x378   : > { %v3256_v12 = vpop.eup %3255 }
 0x379   : > { %v1148_v13 = vmul.f32 %v3256_v12, %v1120_v58  ;;  %v2423_v12 = vld [vmem:[%s3755_s30 + $0x228] sm:$0xff] }
 0x37a   : > { %v3258_v15 = vpop.eup %3257 }
 0x37b   : > { %2877 = vmatprep.mubr.f32.mxu1 %v1148_v13  ;;  %v1151_v18 = vmul.f32 %v3258_v15, %v1123_v62  ;;  %v2422_v13 = vld [vmem:[%s3755_s30 + $0x220] sm:$0xff]  ;;  %v2420_v15 = vld [vmem:[%s3755_s30 + $0x210] sm:$0xff] }
 0x37c   : > { %v3260_v16 = vpop.eup %3259  ;;  %2878 = vmatmul.mubr.f32.vlgmr.msra.gmra.mxu1 %v1149_v14  ;;  %v2421_v14 = vld [vmem:[%s3755_s30 + $0x218] sm:$0xff] }
 0x37d   : > { %v1150_v17 = vmul.f32 %v3260_v16, %v1122_v1  ;;  %2895 = vmatpush3.msra.mxu1 %v2449_v20  ;;  %v1288_v1 = vld [vmem:[%s4024_s4 + $0x8] sm:$0xff] }
 0x37e   : > { %2896 = vmatprep.subr.mxu1 %v2448_v21  ;;  %v2419_v16 = vld [vmem:[%s3755_s30 + $0x208] sm:$0xff] }
 0x37f   : > { %2880 = vmatprep.mubr.f32.mxu1 %v1150_v17  ;;  %2897 = vmatpush3.msra.mxu1 %v2448_v21  ;;  %v2435_v17 = vld [vmem:[%s3755_s30 + $0x288] sm:$0xff] }
 0x380   : > { %2881 = vmatmul.mubr.f32.gmra.mxu1 %v1151_v18  ;;  %2898 = vmatprep.subr.mxu1 %v2447_v22  ;;  %v2418_v18 = vld [vmem:[%s3755_s30 + $0x200] sm:$0xff] }
 0x381   : > { %2899 = vmatpush3.msra.mxu1 %v2447_v22  ;;  %v2468_v22 = vld [vmem:[%s3755_s30 + $0x378] sm:$0xff] }
 0x382   : > { %2900 = vmatprep.subr.mxu1 %v2446_v23 }
 0x383   : > { %2901 = vmatpush3.msra.mxu1 %v2446_v23  ;;  %v2467_v23 = vld [vmem:[%s3755_s30 + $0x370] sm:$0xff] }
 0x384   : > { %2902 = vmatprep.subr.mxu1 %v2445_v24 }
 0x385   : > { %2903 = vmatpush3.msra.mxu1 %v2445_v24  ;;  %v2466_v24 = vld [vmem:[%s3755_s30 + $0x368] sm:$0xff] }
 0x386   : > { %2904 = vmatprep.subr.mxu1 %v2444_v25 }
 0x387   : > { %2905 = vmatpush3.msra.mxu1 %v2444_v25  ;;  %v2465_v25 = vld [vmem:[%s3755_s30 + $0x360] sm:$0xff] }
 0x388   : > { %2906 = vmatprep.subr.mxu1 %v2443_v26 }
 0x389   : > { %2907 = vmatpush3.msra.mxu1 %v2443_v26  ;;  %v2464_v26 = vld [vmem:[%s3755_s30 + $0x358] sm:$0xff] }
 0x38a   : > { %2908 = vmatprep.subr.mxu1 %v2442_v27 }
 0x38b   : > { %2909 = vmatpush3.msra.mxu1 %v2442_v27  ;;  %v2463_v27 = vld [vmem:[%s3755_s30 + $0x350] sm:$0xff] }
 0x38c   : > { %2910 = vmatprep.subr.mxu1 %v2441_v28 }
 0x38d   : > { %2911 = vmatpush3.msra.mxu1 %v2441_v28  ;;  %v2462_v28 = vld [vmem:[%s3755_s30 + $0x348] sm:$0xff] }
 0x38e   : > { %2912 = vmatprep.subr.mxu1 %v2440_v29 }
 0x38f   : > { %2913 = vmatpush3.msra.mxu1 %v2440_v29  ;;  %v2461_v29 = vld [vmem:[%s3755_s30 + $0x340] sm:$0xff] }
 0x390   : > { %2914 = vmatprep.subr.mxu1 %v2439_v30 }
 0x391   : > { %2915 = vmatpush3.msra.mxu1 %v2439_v30  ;;  %v2460_v30 = vld [vmem:[%s3755_s30 + $0x338] sm:$0xff] }
 0x392   : > { %2916 = vmatprep.subr.mxu1 %v2438_v31 }
 0x393   : > { %2917 = vmatpush3.msra.mxu1 %v2438_v31  ;;  %v2459_v31 = vld [vmem:[%s3755_s30 + $0x330] sm:$0xff] }
 0x394   : > { %2918 = vmatprep.subr.mxu1 %v2437_v32 }
 0x395   : > { %2919 = vmatpush3.msra.mxu1 %v2437_v32  ;;  %v2458_v32 = vld [vmem:[%s3755_s30 + $0x328] sm:$0xff] }
 0x396   : > { %2920 = vmatprep.subr.mxu1 %v2436_v33 }
 0x397   : > { %2921 = vmatpush3.msra.mxu1 %v2436_v33  ;;  %v2457_v33 = vld [vmem:[%s3755_s30 + $0x320] sm:$0xff] }
 0x398   : > { %2922 = vmatprep.subr.mxu1 %v2435_v17 }
 0x399   : > { %2923 = vmatpush3.msra.mxu1 %v2435_v17 }
 0x39a   : > { %2924 = vmatprep.subr.mxu1 %v2434_v19 }
 0x39b   : > { %2925 = vmatpush3.msra.mxu1 %v2434_v19 }
 0x39c   : > { %2964 = vmatprep.subr.mxu1 %v2468_v22 }
 0x43c   : > { %v2879_v35 = vpop.f32.mrf.mxu1 }
 0x43d   : > { %v1246_v36 = vadd.f32 %v2879_v35, %v2411_v34  ;;  %v2455_v35 = vld [vmem:[%s3755_s30 + $0x310] sm:$0xff] }
 0x43e   : > { %v1240_v37 = vpop.f32.mrf.mxu1 }
 0x43f   : > { %v2413_v38 = vmul.f32 -1.442695, %v1246_v36  ;;  %v1241_v39 = vadd.f32 %v2411_v34, %v1240_v37  ;;  %v2453_v37 = vld [vmem:[%s3755_s30 + $0x300] sm:$0xff] }
 0x440   : > { %v2882_v40 = vpop.f32.mrf.mxu1 }
 0x441   : > { %v2412_v41 = vmul.f32 -1.442695, %v1241_v39  ;;  %v1256_v42 = vadd.f32 %v2882_v40, %v2411_v34  ;;  %3261 = vpow2.f32 %v2413_v38  ;;  %v2450_v40 = vld [vmem:[%s3761_s13 + $0x2] ss:$0 sm:$0xff] }
 0x442   : > { %v1250_v43 = vpop.f32.mrf.mxu1 }
 0x443   : > { %v2415_v44 = vmul.f32 -1.442695, %v1256_v42  ;;  %v1251_v45 = vadd.f32 %v2411_v34, %v1250_v43  ;;  %3263 = vpow2.f32 %v2412_v41  ;;  %v2456_v34 = vld [vmem:[%s3755_s30 + $0x318] sm:$0xff] }
 0x445   : > { %3265 = vpow2.f32 %v2415_v44  ;;  %v2414_v46 = vmul.f32 -1.442695, %v1251_v45 }
 0x447   : > { %3267 = vpow2.f32 %v2414_v46 }
 0x44e   : > { %v3262_v47 = vpop.eup %3261 }
 0x44f   : > { %v1272_v52 = vadd.f32 1.0, %v3262_v47 }
 0x450   : > { %v3264_v48 = vpop.eup %3263 }
 0x451   : > { %v1271_v55 = vadd.f32 1.0, %v3264_v48 }
 0x452   : > { %v3266_v50 = vpop.eup %3265 }
 0x453   : > { %v1274_v53 = vadd.f32 1.0, %v3266_v50 }
 0x454   : > { %v3268_v54 = vpop.eup %3267 }
 0x455   : > { %3269 = vrcp.f32 %v1274_v53  ;;  %v1273_v56 = vadd.f32 1.0, %v3268_v54 }
 0x456   : > { %3271 = vrcp.f32 %v1272_v52 }
 0x457   : > { %3273 = vrcp.f32 %v1273_v56 }
 0x458   : > { %3275 = vrcp.f32 %v1271_v55 }
 0x462   : > { %v3270_v57 = vpop.eup %3269 }
 0x463   : > { %v3272_v58 = vpop.eup %3271  ;;  %v1286_v59 = vmul.f32 %v3270_v57, %v1256_v42 }
 0x464   : > { %v3274_v60 = vpop.eup %3273  ;;  %v1284_v63 = vmul.f32 %v3272_v58, %v1246_v36  ;;  %v2454_v36 = vld [vmem:[%s3755_s30 + $0x308] sm:$0xff] }
 0x465   : > { %v1285_v61 = vmul.f32 %v3274_v60, %v1251_v45  ;;  %2883 = vmatprep.subr.mxu0 %v1286_v59  ;;  %v3276_v62 = vpop.eup %3275 }
 0x466   : > { %2884 = vmatpush3.msra.mxu0 %v1286_v59  ;;  %v1283_v0 = vmul.f32 %v3276_v62, %v1241_v39  ;;  %v2469_v59 = vld [vmem:[%s3761_s13 + $0x3] ss:$0 sm:$0xff] }
 0x467   : > { %2885 = vmatprep.subr.mxu0 %v1285_v61 }
 0x468   : > { %2886 = vmatpush3.msra.mxu0 %v1285_v61 }
 0x469   : > { %2887 = vmatprep.subr.mxu0 %v1284_v63 }
 0x46a   : > { %2888 = vmatpush3.msra.mxu0 %v1284_v63 }
 0x46b   : > { %2889 = vmatprep.subr.mxu0 %v1283_v0 }
 0x46c   : > { %2890 = vmatpush3.msra.mxu0 %v1283_v0 }
 0x46d   : > { %2892 = vmatmul.mubr.msk.f32.vlgmr.msra.gmra.mxu0 %vm1289_vm2, %v1288_v1  ;;  %2929 = vmatprep.subr.mxu0 %v2433_v2 }
 0x46e   : > { %2930 = vmatpush3.msra.mxu0 %v2433_v2  ;;  %2961 = vmatprep.mubr.f32.mxu0 %v3810_v49 }
 0x46f   : > { %2931 = vmatprep.subr.mxu0 %v2432_v3 }
 0x470   : > { %2932 = vmatpush3.msra.mxu0 %v2432_v3 }
 0x471   : > { %2933 = vmatprep.subr.mxu0 %v2431_v4 }
 0x472   : > { %2934 = vmatpush3.msra.mxu0 %v2431_v4 }
 0x473   : > { %2935 = vmatprep.subr.mxu0 %v2430_v5 }
 0x474   : > { %2936 = vmatpush3.msra.mxu0 %v2430_v5 }
 0x475   : > { %2937 = vmatprep.subr.mxu0 %v2429_v6 }
 0x476   : > { %2938 = vmatpush3.msra.mxu0 %v2429_v6 }
 0x477   : > { %2939 = vmatprep.subr.mxu0 %v2428_v7 }
 0x478   : > { %2940 = vmatpush3.msra.mxu0 %v2428_v7 }
 0x479   : > { %2941 = vmatprep.subr.mxu0 %v2427_v8 }
 0x47a   : > { %2942 = vmatpush3.msra.mxu0 %v2427_v8 }
 0x47b   : > { %2943 = vmatprep.subr.mxu0 %v2426_v9 }
 0x47c   : > { %2944 = vmatpush3.msra.mxu0 %v2426_v9 }
 0x47d   : > { %2945 = vmatprep.subr.mxu0 %v2425_v10 }
 0x47e   : > { %2946 = vmatpush3.msra.mxu0 %v2425_v10 }
 0x47f   : > { %2947 = vmatprep.subr.mxu0 %v2424_v11 }
 0x480   : > { %2948 = vmatpush3.msra.mxu0 %v2424_v11 }
 0x481   : > { %2949 = vmatprep.subr.mxu0 %v2423_v12 }
 0x482   : > { %2950 = vmatpush3.msra.mxu0 %v2423_v12 }
 0x483   : > { %2951 = vmatprep.subr.mxu0 %v2422_v13 }
 0x484   : > { %2952 = vmatpush3.msra.mxu0 %v2422_v13 }
 0x485   : > { %2953 = vmatprep.subr.mxu0 %v2421_v14 }
 0x486   : > { %2954 = vmatpush3.msra.mxu0 %v2421_v14 }
 0x487   : > { %2955 = vmatprep.subr.mxu0 %v2420_v15 }
 0x488   : > { %2956 = vmatpush3.msra.mxu0 %v2420_v15 }
 0x489   : > { %2957 = vmatprep.subr.mxu0 %v2419_v16 }
 0x48a   : > { %2958 = vmatpush3.msra.mxu0 %v2419_v16 }
 0x48b   : > { %2959 = vmatprep.subr.mxu0 %v2418_v18 }
 0x48c   : > { %2960 = vmatpush3.msra.mxu0 %v2418_v18 }
 0x48d   : > { %2962 = vmatmul.mubr.f32.vlgmr.msra.gmra.mxu0 %v3813_v51 }
 0x52d   : > { %v2893_v20 = vpop.f32.mrf.mxu0 }
 0x52f   : > { %v1362_v21 = vpop.f32.mrf.mxu0 }
 0x530   : > { %2926 = vmatprep.mubr.f32.mxu1 %v1362_v21 }
 0x531   : > { %2927 = vmatmul.mubr.f32.vlgmr.msra.gmra.mxu1 %v2893_v20 }
 0x532   : > { %2965 = vmatpush3.msra.mxu1 %v2468_v22 }
 0x533   : > { %2966 = vmatprep.subr.mxu1 %v2467_v23 }
 0x534   : > { %2967 = vmatpush3.msra.mxu1 %v2467_v23 }
 0x535   : > { %2968 = vmatprep.subr.mxu1 %v2466_v24 }
 0x536   : > { %2969 = vmatpush3.msra.mxu1 %v2466_v24 }
 0x537   : > { %2970 = vmatprep.subr.mxu1 %v2465_v25 }
 0x538   : > { %2971 = vmatpush3.msra.mxu1 %v2465_v25 }
 0x539   : > { %2972 = vmatprep.subr.mxu1 %v2464_v26 }
 0x53a   : > { %2973 = vmatpush3.msra.mxu1 %v2464_v26 }
 0x53b   : > { %2974 = vmatprep.subr.mxu1 %v2463_v27 }
 0x53c   : > { %2975 = vmatpush3.msra.mxu1 %v2463_v27 }
 0x53d   : > { %2976 = vmatprep.subr.mxu1 %v2462_v28 }
 0x53e   : > { %2977 = vmatpush3.msra.mxu1 %v2462_v28 }
 0x53f   : > { %2978 = vmatprep.subr.mxu1 %v2461_v29 }
 0x540   : > { %2979 = vmatpush3.msra.mxu1 %v2461_v29 }
 0x541   : > { %2980 = vmatprep.subr.mxu1 %v2460_v30 }
 0x542   : > { %2981 = vmatpush3.msra.mxu1 %v2460_v30 }
 0x543   : > { %2982 = vmatprep.subr.mxu1 %v2459_v31 }
 0x544   : > { %2983 = vmatpush3.msra.mxu1 %v2459_v31 }
 0x545   : > { %2984 = vmatprep.subr.mxu1 %v2458_v32 }
 0x546   : > { %2985 = vmatpush3.msra.mxu1 %v2458_v32 }
 0x547   : > { %2986 = vmatprep.subr.mxu1 %v2457_v33 }
 0x548   : > { %2987 = vmatpush3.msra.mxu1 %v2457_v33 }
 0x549   : > { %2988 = vmatprep.subr.mxu1 %v2456_v34 }
 0x54a   : > { %2989 = vmatpush3.msra.mxu1 %v2456_v34 }
 0x54b   : > { %2990 = vmatprep.subr.mxu1 %v2455_v35 }
 0x54c   : > { %2991 = vmatpush3.msra.mxu1 %v2455_v35 }
 0x54d   : > { %2992 = vmatprep.subr.mxu1 %v2454_v36  ;;  %v2963_v38 = vpop.f32.mrf.mxu0 }
 0x54e   : > { %2993 = vmatpush3.msra.mxu1 %v2454_v36 }
 0x54f   : > { %2994 = vmatprep.subr.mxu1 %v2453_v37  ;;  %v1546_v42 = vpop.f32.mrf.mxu0 }
 0x550   : > { %2995 = vmatpush3.msra.mxu1 %v2453_v37 }
 0x5f1   : > { %v2928_v39 = vpop.f32.mrf.mxu1 }
 0x5f2   : > { %v1552_v41 = vadd.f32 %v2963_v38, %v2928_v39 }
 0x5f3   : > { %v1471_v43 = vpop.f32.mrf.mxu1 }
 0x5f4   : > { %v1561_v44 = vadd.f32 %v2450_v40, %v1552_v41  ;;  %v1547_v45 = vadd.f32 %v1546_v42, %v1471_v43 }
 0x5f6   : > { %v2452_v46 = vmul.f32 -1.442695, %v1561_v44  ;;  %v1560_v47 = vadd.f32 %v2450_v40, %v1547_v45 }
 0x5f8   : > { %3277 = vpow2.f32 %v2452_v46  ;;  %v2451_v48 = vmul.f32 -1.442695, %v1560_v47 }
 0x5fa   : > { %3279 = vpow2.f32 %v2451_v48 }
 0x605   : > { %v3278_v50 = vpop.eup %3277 }
 0x606   : > { %v1569_v52 = vadd.f32 1.0, %v3278_v50 }
 0x607   : > { %v3280_v53 = vpop.eup %3279 }
 0x608   : > { %v1568_v54 = vadd.f32 1.0, %v3280_v53  ;;  %3281 = vrcp.f32 %v1569_v52 }
 0x60a   : > { %3283 = vrcp.f32 %v1568_v54 }
 0x615   : > { %v3282_v55 = vpop.eup %3281 }
 0x616   : > { %v1575_v58 = vmul.f32 %v3282_v55, %v1561_v44 }
 0x617   : > { %v3284_v56 = vpop.eup %3283 }
 0x618   : > { %v1574_v57 = vmul.f32 %v3284_v56, %v1560_v47 }
 0x61a   : > { %2996 = vmatprep.mubr.f32.mxu1 %v1574_v57 }
 0x61b   : > { %2997 = vmatmul.mubr.f32.vlgmr.msra.gmra.mxu1 %v1575_v58 }
 0x6db   : > { %v2998_v60 = vpop.f32.mrf.mxu1 }
 0x6dc   : > { %v1670_v61 = vadd.f32 %v2998_v60, %v2469_v59 }
 0x6dd   : > { %v1664_v62 = vpop.f32.mrf.mxu1 }
 0x6de   : > { %v1674_v63 = vadd.f32 %v1670_v61, %v3813_v51  ;;  %v1665_v0 = vadd.f32 %v2469_v59, %v1664_v62  ;;  %1680 = sbr.rel (%p2470_p1) target bundleno = 2958 (0xb8e), region = 100 }
 0x6e0   : > { %1676 = vst [vmem:[#allocation2 + $0x8] sm:$0xff] %v1674_v63  ;;  %v1673_v1 = vadd.f32 %v1665_v0, %v3810_v49 }
 0x6e2   : > { %1675 = vst [vmem:[#allocation2] sm:$0xff] %v1673_v1 }
 0x6e3   : > { %v1698_v2 = vld [vmem:[#allocation9 + $0x78] sm:$0xff]  ;;  %v1697_v3 = vld [vmem:[#allocation9 + $0x70] sm:$0xff]  ;;  %v1696_v4 = vld [vmem:[#allocation9 + $0x68] sm:$0xff]  ;;  %vm3522_vm3 = vmmov 0   ;;  %vm2097_vm4 = vcmask 1041408  }
 0x6e4   : > { %2999 = vmatprep.subr.mxu0 %v1698_v2  ;;  %v1695_v5 = vld [vmem:[#allocation9 + $0x60] sm:$0xff]  ;;  %v1694_v51 = vld [vmem:[#allocation9 + $0x58] sm:$0xff]  ;;  %v1693_v49 = vld [vmem:[#allocation9 + $0x50] sm:$0xff] }
 0x6e5   : > { %3000 = vmatpush3.msra.mxu0 %v1698_v2  ;;  %v1692_v7 = vld [vmem:[#allocation9 + $0x48] sm:$0xff]  ;;  %v1691_v8 = vld [vmem:[#allocation9 + $0x40] sm:$0xff]  ;;  %v1690_v9 = vld [vmem:[#allocation9 + $0x38] sm:$0xff] }
 0x6e6   : > { %3001 = vmatprep.subr.mxu0 %v1697_v3  ;;  %v1689_v10 = vld [vmem:[#allocation9 + $0x30] sm:$0xff]  ;;  %v1688_v11 = vld [vmem:[#allocation9 + $0x28] sm:$0xff]  ;;  %v1687_v12 = vld [vmem:[#allocation9 + $0x20] sm:$0xff] }
 0x6e7   : > { %3002 = vmatpush3.msra.mxu0 %v1697_v3  ;;  %v1686_v13 = vld [vmem:[#allocation9 + $0x18] sm:$0xff]  ;;  %v1685_v14 = vld [vmem:[#allocation9 + $0x10] sm:$0xff]  ;;  %v1684_v15 = vld [vmem:[#allocation9 + $0x8] sm:$0xff] }
 0x6e8   : > { %3003 = vmatprep.subr.mxu0 %v1696_v4  ;;  %v1683_v16 = vld [vmem:[#allocation9] sm:$0xff]  ;;  %v1848_v18 = vld [vmem:[#allocation9 + $0xf8] sm:$0xff]  ;;  %v1847_v19 = vld [vmem:[#allocation9 + $0xf0] sm:$0xff] }
 0x6e9   : > { %v1681_v6 = vld [vmem:[#allocation2] sm:$0xff]  ;;  %3004 = vmatpush3.msra.mxu0 %v1696_v4  ;;  %v1682_v17 = vld [vmem:[#allocation2 + $0x8] sm:$0xff]  ;;  %3034 = vmatprep.subr.mxu1 %v1848_v18  ;;  %v1846_v20 = vld [vmem:[#allocation9 + $0xe8] sm:$0xff] }
 0x6ea   : > { %3031 = vmatprep.mubr.f32.mxu0 %v1681_v6  ;;  %3005 = vmatprep.subr.mxu0 %v1695_v5  ;;  %v1845_v21 = vld [vmem:[#allocation9 + $0xe0] sm:$0xff]  ;;  %v1844_v22 = vld [vmem:[#allocation9 + $0xd8] sm:$0xff]  ;;  %v1843_v23 = vld [vmem:[#allocation9 + $0xd0] sm:$0xff] }
 0x6eb   : > { %3006 = vmatpush3.msra.mxu0 %v1695_v5  ;;  %3035 = vmatpush3.msra.mxu1 %v1848_v18  ;;  %v1842_v24 = vld [vmem:[#allocation9 + $0xc8] sm:$0xff]  ;;  %v1841_v25 = vld [vmem:[#allocation9 + $0xc0] sm:$0xff]  ;;  %v1840_v26 = vld [vmem:[#allocation9 + $0xb8] sm:$0xff] }
 0x6ec   : > { %3007 = vmatprep.subr.mxu0 %v1694_v51  ;;  %3036 = vmatprep.subr.mxu1 %v1847_v19  ;;  %v1839_v27 = vld [vmem:[#allocation9 + $0xb0] sm:$0xff]  ;;  %v1838_v28 = vld [vmem:[#allocation9 + $0xa8] sm:$0xff]  ;;  %v1837_v29 = vld [vmem:[#allocation9 + $0xa0] sm:$0xff] }
 0x6ed   : > { %3008 = vmatpush3.msra.mxu0 %v1694_v51  ;;  %3037 = vmatpush3.msra.mxu1 %v1847_v19  ;;  %v1836_v30 = vld [vmem:[#allocation9 + $0x98] sm:$0xff]  ;;  %v1835_v31 = vld [vmem:[#allocation9 + $0x90] sm:$0xff]  ;;  %v1834_v32 = vld [vmem:[#allocation9 + $0x88] sm:$0xff] }
 0x6ee   : > { %3009 = vmatprep.subr.mxu0 %v1693_v49  ;;  %3038 = vmatprep.subr.mxu1 %v1846_v20  ;;  %v1833_v33 = vld [vmem:[#allocation9 + $0x80] sm:$0xff]  ;;  %v2017_v18 = vld [vmem:[#allocation9 + $0x168] sm:$0xff] }
 0x6ef   : > { %3010 = vmatpush3.msra.mxu0 %v1693_v49  ;;  %3039 = vmatpush3.msra.mxu1 %v1846_v20  ;;  %v2471_v35 = vld [vmem:[#allocation10] ss:$0 sm:$0xff]  ;;  %v2472_v63 = vld [vmem:[#allocation10 + $0x1] ss:$0 sm:$0xff]  ;;  %v2473_v2 = vld [vmem:[#allocation10 + $0x2] ss:$0 sm:$0xff] }
 0x6f0   : > { %3011 = vmatprep.subr.mxu0 %v1692_v7  ;;  %3040 = vmatprep.subr.mxu1 %v1845_v21  ;;  %v2016_v19 = vld [vmem:[#allocation9 + $0x160] sm:$0xff]  ;;  %v2015_v20 = vld [vmem:[#allocation9 + $0x158] sm:$0xff] }
 0x6f1   : > { %3012 = vmatpush3.msra.mxu0 %v1692_v7  ;;  %3041 = vmatpush3.msra.mxu1 %v1845_v21  ;;  %v2014_v21 = vld [vmem:[#allocation9 + $0x150] sm:$0xff] }
 0x6f2   : > { %3013 = vmatprep.subr.mxu0 %v1691_v8  ;;  %3042 = vmatprep.subr.mxu1 %v1844_v22 }
 0x6f3   : > { %3014 = vmatpush3.msra.mxu0 %v1691_v8  ;;  %3043 = vmatpush3.msra.mxu1 %v1844_v22  ;;  %v2013_v22 = vld [vmem:[#allocation9 + $0x148] sm:$0xff] }
 0x6f4   : > { %3015 = vmatprep.subr.mxu0 %v1690_v9  ;;  %3044 = vmatprep.subr.mxu1 %v1843_v23 }
 0x6f5   : > { %3016 = vmatpush3.msra.mxu0 %v1690_v9  ;;  %3045 = vmatpush3.msra.mxu1 %v1843_v23  ;;  %v2012_v23 = vld [vmem:[#allocation9 + $0x140] sm:$0xff] }
 0x6f6   : > { %3017 = vmatprep.subr.mxu0 %v1689_v10  ;;  %3046 = vmatprep.subr.mxu1 %v1842_v24 }
 0x6f7   : > { %3018 = vmatpush3.msra.mxu0 %v1689_v10  ;;  %3047 = vmatpush3.msra.mxu1 %v1842_v24  ;;  %v2011_v24 = vld [vmem:[#allocation9 + $0x138] sm:$0xff] }
 0x6f8   : > { %3019 = vmatprep.subr.mxu0 %v1688_v11  ;;  %3048 = vmatprep.subr.mxu1 %v1841_v25 }
 0x6f9   : > { %3020 = vmatpush3.msra.mxu0 %v1688_v11  ;;  %3049 = vmatpush3.msra.mxu1 %v1841_v25  ;;  %v2010_v25 = vld [vmem:[#allocation9 + $0x130] sm:$0xff] }
 0x6fa   : > { %3021 = vmatprep.subr.mxu0 %v1687_v12  ;;  %3050 = vmatprep.subr.mxu1 %v1840_v26 }
 0x6fb   : > { %3022 = vmatpush3.msra.mxu0 %v1687_v12  ;;  %3051 = vmatpush3.msra.mxu1 %v1840_v26  ;;  %v2009_v26 = vld [vmem:[#allocation9 + $0x128] sm:$0xff] }
 0x6fc   : > { %3023 = vmatprep.subr.mxu0 %v1686_v13  ;;  %3052 = vmatprep.subr.mxu1 %v1839_v27 }
 0x6fd   : > { %3024 = vmatpush3.msra.mxu0 %v1686_v13  ;;  %3053 = vmatpush3.msra.mxu1 %v1839_v27  ;;  %v2008_v27 = vld [vmem:[#allocation9 + $0x120] sm:$0xff] }
 0x6fe   : > { %3025 = vmatprep.subr.mxu0 %v1685_v14  ;;  %3054 = vmatprep.subr.mxu1 %v1838_v28 }
 0x6ff   : > { %3026 = vmatpush3.msra.mxu0 %v1685_v14  ;;  %3055 = vmatpush3.msra.mxu1 %v1838_v28  ;;  %v2007_v28 = vld [vmem:[#allocation9 + $0x118] sm:$0xff] }
 0x700   : > { %3027 = vmatprep.subr.mxu0 %v1684_v15  ;;  %3056 = vmatprep.subr.mxu1 %v1837_v29 }
 0x701   : > { %3028 = vmatpush3.msra.mxu0 %v1684_v15  ;;  %3057 = vmatpush3.msra.mxu1 %v1837_v29  ;;  %v3521_v15 = vmov 0.0   ;;  %v2006_v29 = vld [vmem:[#allocation9 + $0x110] sm:$0xff] }
 0x702   : > { %3029 = vmatprep.subr.mxu0 %v1683_v16  ;;  %3058 = vmatprep.subr.mxu1 %v1836_v30 }
 0x703   : > { %3030 = vmatpush3.msra.mxu0 %v1683_v16  ;;  %3059 = vmatpush3.msra.mxu1 %v1836_v30  ;;  %v2019_v16 = vld [vmem:[#allocation9 + $0x178] sm:$0xff]  ;;  %v2005_v30 = vld [vmem:[#allocation9 + $0x108] sm:$0xff] }
 0x704   : > { %3032 = vmatmul.mubr.f32.vlgmr.msra.gmra.mxu0 %v1682_v17  ;;  %3060 = vmatprep.subr.mxu1 %v1835_v31  ;;  %v2018_v17 = vld [vmem:[#allocation9 + $0x170] sm:$0xff] }
 0x705   : > { %3061 = vmatpush3.msra.mxu1 %v1835_v31  ;;  %3069 = vmatprep.subr.mxu0 %v3521_v15  ;;  %v2476_v31 = vld [vmem:[#allocation10 + $0x3] ss:$0 sm:$0xff] }
 0x706   : > { %3062 = vmatprep.subr.mxu1 %v1834_v32  ;;  %3073 = vmatprep.mubr.msk.f32.mxu0 %vm3522_vm3, %v3521_v15 }
 0x707   : > { %3063 = vmatpush3.msra.mxu1 %v1834_v32 }
 0x708   : > { %3064 = vmatprep.subr.mxu1 %v1833_v33 }
 0x709   : > { %3065 = vmatpush3.msra.mxu1 %v1833_v33 }
 0x70a   : > { %3076 = vmatprep.subr.mxu1 %v3521_v15 }
 0x7c4   : > { %v3033_v34 = vpop.f32.mrf.mxu0 }
 0x7c5   : > { %v1776_v37 = vadd.f32 %v3033_v34, %v2471_v35 }
 0x7c6   : > { %v1770_v36 = vpop.f32.mrf.mxu0 }
 0x7c7   : > { %v1771_v38 = vadd.f32 %v2471_v35, %v1770_v36  ;;  %v1929_v36 = vld [vmem:[%s4025_s5] sm:$0x3] }
 0x7c9   : > { %v1781_v39 = vadd.f32 %v1776_v37, %v1771_v38 }
 0x7cb   : > { %v1782_v40 = vrot.slane %v1781_v39, 4 }
 0x7cd   : > { %v1783_v41 = vadd.f32 %v1782_v40, %v1781_v39  ;;  %v2153_v40 = vld [vmem:[#allocation9 + $0x1f8] sm:$0xff] }
 0x7cf   : > { %v1784_v42 = vrot.slane %v1783_v41, 2 }
 0x7d1   : > { %v1785_v43 = vadd.f32 %v1784_v42, %v1783_v41  ;;  %v2152_v41 = vld [vmem:[#allocation9 + $0x1f0] sm:$0xff]  ;;  %v2151_v42 = vld [vmem:[#allocation9 + $0x1e8] sm:$0xff] }
 0x7d3   : > { %v1786_v44 = vrot.slane %v1785_v43, 1 }
 0x7d5   : > { %v1787_v45 = vadd.f32 %v1786_v44, %v1785_v43  ;;  %v2150_v43 = vld [vmem:[#allocation9 + $0x1e0] sm:$0xff]  ;;  %v2149_v44 = vld [vmem:[#allocation9 + $0x1d8] sm:$0xff] }
 0x7d7   : > { %v1789_v46 = vmul.f32 0.0625, %v1787_v45  ;;  %v2148_v45 = vld [vmem:[#allocation9 + $0x1d0] sm:$0xff] }
 0x7d9   : > { %v1790_v47 = vsub.f32 %v1771_v38, %v1789_v46  ;;  %v1791_v48 = vsub.f32 %v1776_v37, %v1789_v46  ;;  %v2004_v37 = vld [vmem:[#allocation9 + $0x100] sm:$0xff]  ;;  %v2147_v46 = vld [vmem:[#allocation9 + $0x1c8] sm:$0xff] }
 0x7db   : > { %v1792_v50 = vmul.f32 %v1790_v47, %v1790_v47  ;;  %v1793_v52 = vmul.f32 %v1791_v48, %v1791_v48 }
 0x7dd   : > { %v1794_v53 = vadd.f32 %v1793_v52, %v1792_v50  ;;  %v2144_v50 = vld [vmem:[#allocation9 + $0x1b0] sm:$0xff]  ;;  %v2143_v52 = vld [vmem:[#allocation9 + $0x1a8] sm:$0xff] }
 0x7df   : > { %v1795_v54 = vrot.slane %v1794_v53, 4 }
 0x7e1   : > { %v1796_v55 = vadd.f32 %v1795_v54, %v1794_v53  ;;  %v2142_v53 = vld [vmem:[#allocation9 + $0x1a0] sm:$0xff]  ;;  %v2141_v54 = vld [vmem:[#allocation9 + $0x198] sm:$0xff] }
 0x7e3   : > { %v1797_v56 = vrot.slane %v1796_v55, 2 }
 0x7e5   : > { %v1798_v57 = vadd.f32 %v1797_v56, %v1796_v55  ;;  %v2140_v55 = vld [vmem:[#allocation9 + $0x190] sm:$0xff]  ;;  %v2139_v56 = vld [vmem:[#allocation9 + $0x188] sm:$0xff] }
 0x7e7   : > { %v1799_v58 = vrot.slane %v1798_v57, 1 }
 0x7e9   : > { %v1800_v59 = vadd.f32 %v1799_v58, %v1798_v57  ;;  %v2138_v57 = vld [vmem:[#allocation9 + $0x180] sm:$0xff] }
 0x7ea   : > { %v2478_v58 = vld [vmem:[#allocation10 + $0x4] ss:$0 sm:$0xff] }
 0x7eb   : > { %v1801_v60 = vmul.f32 0.0625, %v1800_v59 }
 0x7ed   : > { %v1802_v61 = vadd.f32 1e-05, %v1801_v60 }
 0x7ef   : > { %3285 = vrsqrt.f32 %v1802_v61 }
 0x7fc   : > { %v3286_v62 = vpop.eup %3285 }
 0x7fd   : > { %v1804_v0 = vmul.f32 %v3286_v62, %v1790_v47  ;;  %v1805_v1 = vmul.f32 %v3286_v62, %v1791_v48  ;;  %v2146_v47 = vld [vmem:[#allocation9 + $0x1c0] sm:$0xff]  ;;  %v2145_v48 = vld [vmem:[#allocation9 + $0x1b8] sm:$0xff] }
 0x7ff   : > { %v1810_v3 = vmul.f32 %v2472_v63, %v1804_v0  ;;  %v1811_v4 = vmul.f32 %v2472_v63, %v1805_v1 }
 0x801   : > { %v1816_v5 = vadd.f32 %v2473_v2, %v1810_v3  ;;  %v1817_v6 = vadd.f32 %v2473_v2, %v1811_v4 }
 0x803   : > { %v2474_v51 = vmul.f32 -1.442695, %v1816_v5  ;;  %v2475_v49 = vmul.f32 -1.442695, %v1817_v6 }
 0x805   : > { %3287 = vpow2.f32 %v2474_v51 }
 0x806   : > { %3289 = vpow2.f32 %v2475_v49 }
 0x812   : > { %v3288_v7 = vpop.eup %3287 }
 0x813   : > { %v3290_v8 = vpop.eup %3289  ;;  %v1824_v9 = vadd.f32 1.0, %v3288_v7 }
 0x814   : > { %v1825_v10 = vadd.f32 1.0, %v3290_v8 }
 0x815   : > { %3291 = vrcp.f32 %v1824_v9 }
 0x816   : > { %3293 = vrcp.f32 %v1825_v10 }
 0x822   : > { %v3292_v11 = vpop.eup %3291 }
 0x823   : > { %v3294_v12 = vpop.eup %3293  ;;  %v1830_v13 = vmul.f32 %v3292_v11, %v1816_v5 }
 0x824   : > { %v1831_v14 = vmul.f32 %v3294_v12, %v1817_v6 }
 0x825   : > { %3066 = vmatprep.mubr.f32.mxu1 %v1830_v13 }
 0x826   : > { %3067 = vmatmul.mubr.f32.vlgmr.msra.gmra.mxu1 %v1831_v14 }
 0x827   : > { %3108 = vmatprep.mubr.msk.f32.mxu1 %vm3522_vm3, %v3521_v15  ;;  %3077 = vmatpush3.msra.mxu1 %v2019_v16  ;;  %v2479_v16 = vld [vmem:[#allocation10 + $0x5] ss:$0 sm:$0xff] }
 0x828   : > { %3078 = vmatprep.subr.mxu1 %v3521_v15 }
 0x829   : > { %3079 = vmatpush3.msra.mxu1 %v2018_v17 }
 0x82a   : > { %3080 = vmatprep.subr.mxu1 %v3521_v15 }
 0x82b   : > { %3081 = vmatpush3.msra.mxu1 %v2017_v18  ;;  %v2480_v18 = vld [vmem:[#allocation10 + $0x6] ss:$0 sm:$0xff] }
 0x82c   : > { %3082 = vmatprep.subr.mxu1 %v3521_v15 }
 0x82d   : > { %3083 = vmatpush3.msra.mxu1 %v2016_v19 }
 0x82e   : > { %3084 = vmatprep.subr.mxu1 %v3521_v15 }
 0x82f   : > { %3085 = vmatpush3.msra.mxu1 %v2015_v20 }
 0x830   : > { %3086 = vmatprep.subr.mxu1 %v3521_v15 }
 0x831   : > { %3087 = vmatpush3.msra.mxu1 %v2014_v21 }
 0x832   : > { %3088 = vmatprep.subr.mxu1 %v3521_v15 }
 0x833   : > { %3089 = vmatpush3.msra.mxu1 %v2013_v22 }
 0x834   : > { %3090 = vmatprep.subr.mxu1 %v3521_v15 }
 0x835   : > { %3091 = vmatpush3.msra.mxu1 %v2012_v23 }
 0x836   : > { %3092 = vmatprep.subr.mxu1 %v3521_v15 }
 0x837   : > { %3093 = vmatpush3.msra.mxu1 %v2011_v24 }
 0x838   : > { %3094 = vmatprep.subr.mxu1 %v3521_v15 }
 0x839   : > { %3095 = vmatpush3.msra.mxu1 %v2010_v25 }
 0x83a   : > { %3096 = vmatprep.subr.mxu1 %v3521_v15 }
 0x83b   : > { %3097 = vmatpush3.msra.mxu1 %v2009_v26  ;;  %v2482_v26 = vld [vmem:[#allocation10 + $0x7] ss:$0 sm:$0xff] }
 0x83c   : > { %3098 = vmatprep.subr.mxu1 %v3521_v15 }
 0x83d   : > { %3099 = vmatpush3.msra.mxu1 %v2008_v27 }
 0x83e   : > { %3100 = vmatprep.subr.mxu1 %v3521_v15 }
 0x83f   : > { %3101 = vmatpush3.msra.mxu1 %v2007_v28 }
 0x840   : > { %3102 = vmatprep.subr.mxu1 %v3521_v15 }
 0x841   : > { %3103 = vmatpush3.msra.mxu1 %v2006_v29 }
 0x842   : > { %3104 = vmatprep.subr.mxu1 %v3521_v15 }
 0x843   : > { %3105 = vmatpush3.msra.mxu1 %v2005_v30 }
 0x844   : > { %3106 = vmatprep.subr.mxu1 %v3521_v15 }
 0x845   : > { %3107 = vmatpush3.msra.mxu1 %v2004_v37 }
 0x8e6   : > { %v3068_v32 = vpop.f32.mrf.mxu1 }
 0x8e7   : > { %v1926_v33 = vadd.f32 %v3068_v32, %v2476_v31 }
 0x8e8   : > { %v1920_v34 = vpop.f32.mrf.mxu1 }
 0x8e9   : > { %v1921_v35 = vadd.f32 %v2476_v31, %v1920_v34  ;;  %3070 = vmatpush3.msra.mxu0 %v1926_v33 }
 0x8ea   : > { %3071 = vmatprep.subr.mxu0 %v3521_v15 }
 0x8eb   : > { %3072 = vmatpush3.msra.mxu0 %v1921_v35 }
 0x8ec   : > { %3074 = vmatmul.mubr.msk.f32.vlgmr.msra.gmra.mxu0 %vm810_vm1, %v1929_v36  ;;  %3111 = vmatprep.subr.mxu0 %v3521_v15 }
 0x8ed   : > { %3143 = vmatprep.mubr.msk.f32.mxu0 %vm3522_vm3, %v3521_v15  ;;  %3112 = vmatpush3.msra.mxu0 %v2153_v40 }
 0x8ee   : > { %3113 = vmatprep.subr.mxu0 %v3521_v15 }
 0x8ef   : > { %3114 = vmatpush3.msra.mxu0 %v2152_v41 }
 0x8f0   : > { %3115 = vmatprep.subr.mxu0 %v3521_v15 }
 0x8f1   : > { %3116 = vmatpush3.msra.mxu0 %v2151_v42 }
 0x8f2   : > { %3117 = vmatprep.subr.mxu0 %v3521_v15 }
 0x8f3   : > { %3118 = vmatpush3.msra.mxu0 %v2150_v43 }
 0x8f4   : > { %3119 = vmatprep.subr.mxu0 %v3521_v15 }
 0x8f5   : > { %3120 = vmatpush3.msra.mxu0 %v2149_v44 }
 0x8f6   : > { %3121 = vmatprep.subr.mxu0 %v3521_v15 }
 0x8f7   : > { %3122 = vmatpush3.msra.mxu0 %v2148_v45 }
 0x8f8   : > { %3123 = vmatprep.subr.mxu0 %v3521_v15 }
 0x8f9   : > { %3124 = vmatpush3.msra.mxu0 %v2147_v46 }
 0x8fa   : > { %3125 = vmatprep.subr.mxu0 %v3521_v15 }
 0x8fb   : > { %3126 = vmatpush3.msra.mxu0 %v2146_v47 }
 0x8fc   : > { %3127 = vmatprep.subr.mxu0 %v3521_v15 }
 0x8fd   : > { %3128 = vmatpush3.msra.mxu0 %v2145_v48 }
 0x8fe   : > { %3129 = vmatprep.subr.mxu0 %v3521_v15 }
 0x8ff   : > { %3130 = vmatpush3.msra.mxu0 %v2144_v50 }
 0x900   : > { %3131 = vmatprep.subr.mxu0 %v3521_v15 }
 0x901   : > { %3132 = vmatpush3.msra.mxu0 %v2143_v52 }
 0x902   : > { %3133 = vmatprep.subr.mxu0 %v3521_v15 }
 0x903   : > { %3134 = vmatpush3.msra.mxu0 %v2142_v53 }
 0x904   : > { %3135 = vmatprep.subr.mxu0 %v3521_v15 }
 0x905   : > { %3136 = vmatpush3.msra.mxu0 %v2141_v54 }
 0x906   : > { %3137 = vmatprep.subr.mxu0 %v3521_v15 }
 0x907   : > { %3138 = vmatpush3.msra.mxu0 %v2140_v55 }
 0x908   : > { %3139 = vmatprep.subr.mxu0 %v3521_v15 }
 0x909   : > { %3140 = vmatpush3.msra.mxu0 %v2139_v56 }
 0x90a   : > { %3141 = vmatprep.subr.mxu0 %v3521_v15 }
 0x90b   : > { %3142 = vmatpush3.msra.mxu0 %v2138_v57 }
 0x9ac   : > { %v1999_v38 = vpop.f32.mrf.mxu0 }
 0x9ad   : > { %3109 = vmatmul.mubr.f32.vlgmr.msra.gmra.mxu1 %v1999_v38 }
 0x9ae   : > { %v3075_v39 = vpop.f32.mrf.mxu0 }
 0xa6d   : > { %v2091_v59 = vpop.f32.mrf.mxu1 }
 0xa6e   : > { %v2092_v60 = vadd.f32 %v2478_v58, %v2091_v59 }
 0xa6f   : > { %v3110_v61 = vpop.f32.mrf.mxu1 }
 0xa70   : > { %v2098_v62 = vsel %vm2097_vm4, %v2092_v60, 0.0 }
 0xa71   : > { %v2099_v63 = vrot.slane %v2098_v62, 4 }
 0xa73   : > { %v2100_v0 = vadd.f32 %v2099_v63, %v2098_v62 }
 0xa75   : > { %v2101_v1 = vrot.slane %v2100_v0, 2 }
 0xa77   : > { %v2102_v2 = vadd.f32 %v2101_v1, %v2100_v0 }
 0xa79   : > { %v2103_v3 = vrot.slane %v2102_v2, 1 }
 0xa7b   : > { %v2104_v4 = vadd.f32 %v2103_v3, %v2102_v2 }
 0xa7d   : > { %v2106_v5 = vmul.f32 0.5, %v2104_v4 }
 0xa7f   : > { %v2107_v6 = vsub.f32 %v2092_v60, %v2106_v5 }
 0xa81   : > { %v2108_v51 = vmul.f32 %v2107_v6, %v2107_v6 }
 0xa83   : > { %v2109_v49 = vsel %vm2097_vm4, %v2108_v51, 0.0 }
 0xa84   : > { %v2110_v7 = vrot.slane %v2109_v49, 4 }
 0xa86   : > { %v2111_v8 = vadd.f32 %v2110_v7, %v2109_v49 }
 0xa88   : > { %v2112_v9 = vrot.slane %v2111_v8, 2 }
 0xa8a   : > { %v2113_v10 = vadd.f32 %v2112_v9, %v2111_v8 }
 0xa8c   : > { %v2114_v11 = vrot.slane %v2113_v10, 1 }
 0xa8e   : > { %v2115_v12 = vadd.f32 %v2114_v11, %v2113_v10 }
 0xa90   : > { %v2116_v13 = vmul.f32 0.5, %v2115_v12 }
 0xa92   : > { %v2117_v14 = vadd.f32 1e-05, %v2116_v13 }
 0xa94   : > { %3295 = vrsqrt.f32 %v2117_v14 }
 0xaa1   : > { %v3296_v15 = vpop.eup %3295 }
 0xaa2   : > { %v2119_v17 = vmul.f32 %v3296_v15, %v2107_v6 }
 0xaa4   : > { %v2124_v19 = vmul.f32 %v2479_v16, %v2119_v17 }
 0xaa6   : > { %v2129_v20 = vadd.f32 %v2480_v18, %v2124_v19 }
 0xaa8   : > { %v2481_v21 = vmul.f32 -1.442695, %v2129_v20 }
 0xaaa   : > { %3297 = vpow2.f32 %v2481_v21 }
 0xab7   : > { %v3298_v22 = vpop.eup %3297 }
 0xab8   : > { %v2133_v23 = vadd.f32 1.0, %v3298_v22 }
 0xaba   : > { %3299 = vrcp.f32 %v2133_v23 }
 0xac7   : > { %v3300_v24 = vpop.eup %3299 }
 0xac8   : > { %v2136_v25 = vmul.f32 %v3300_v24, %v2129_v20 }
 0xaca   : > { %3144 = vmatmul.mubr.f32.vlgmr.msra.gmra.mxu0 %v2136_v25 }
 0xb8a   : > { %v2225_v27 = vpop.f32.mrf.mxu0 }
 0xb8b   : > { %v2226_v28 = vadd.f32 %v2482_v26, %v2225_v27 }
 0xb8c   : > { %v3145_v29 = vpop.f32.mrf.mxu0 }
 0xb8d   : > { %2229 = vst [vmem:[%s4032_s12] sm:$0x3] %v2226_v28 }
 0xb8e PF: > { %s4066_s24 = sld [smem:[#allocation17_spill]]  ;;  %s4068_s21 = smov %s3503_s22 }
 0xb8f   : > { %s4067_s29 = sld [smem:[#allocation18_spill]]  ;;  %s4069_s22 = smov %s3507_s23 }
 0xb94   : > { %p22_p5 = scmp.ge.s32.totalorder %s4066_s24, 6  }
 0xb95   : > { %s4070_s23 = smov %s4067_s29 }
 0xb96   :  { %24 = sbr.rel (!%p22_p5) target bundleno = 8 (0x8), region = 147 }
 0xb9b   :  { %2241 = vsyncpa [#allocation4], 1 }
 0xb9c   :  { %2243 = vsyncpa [#allocation4 + $0x1], 1 }
 0xb9d   :  { %2244 = vsyncpa [#allocation6], 1 }
 0xb9e   :  { %2245 = vsyncpa [#allocation11], 1 }

</bundles_post_ra>
